<compile_context>
chip_gen: v7x
topology: tpu7x:2x2x1
jax: 0.10.0
libtpu: 0.0.40
codegen_flags: <defaults>
</compile_context>

<pallas_src>
import functools

import jax
import jax.numpy as jnp
from jax import lax
from jax.experimental import pallas as pl
from jax.experimental.pallas import tpu as pltpu


def _upblock_kernel(xa_ref, xb1_ref, xb2_ref, w_ref, b_ref, o_ref, *,
                    h_tile, w_out, c, negative_slope):
    """Fused conv3x3 + bias + LeakyReLU + nearest-2x upsample for one row tile.

    xa_ref : (1, h_tile, W+2, C)  bf16  padded rows [j*h_tile, j*h_tile+h_tile)
    xb1_ref: (1, 1, W+2, C)       bf16  halo row  j*h_tile + h_tile
    xb2_ref: (1, 1, W+2, C)       bf16  halo row  j*h_tile + h_tile + 1
    w_ref  : (9*C, 2*C)           bf16  [dy*3C + dx*C + ci, b*C + co] (dup cols)
    b_ref  : (1, 2*C)             f32   duplicated bias
    o_ref  : (1, h_tile, 2, W, 2*C) bf16: o[i, a, j, b*C+co] = y[i, j, co]
    """
    # Stitch the (h_tile+2)-row padded slab: main block + 2 halo rows
    # (outer-dim concat -> cheap, no lane/sublane shuffling).
    slab = jnp.concatenate([xa_ref[0], xb1_ref[0], xb2_ref[0]], axis=0)

    # Hoisted horizontal 3-tap lane concat over the FULL slab (done once, not
    # once per dy):  (h_tile+2, W, 3C)
    cat3 = jnp.concatenate(
        [slab[:, 0:w_out], slab[:, 1:w_out + 1], slab[:, 2:w_out + 2]],
        axis=-1)

    # Merge the three vertical taps into a single K = 9C MXU contraction.
    big = jnp.concatenate(
        [cat3[0:h_tile], cat3[1:h_tile + 1], cat3[2:h_tile + 2]],
        axis=-1)                                        # (h_tile, W, 9C)
    acc = jnp.dot(big.reshape(h_tile * w_out, 9 * c), w_ref[...],
                  preferred_element_type=jnp.float32)   # (M, 2C) f32

    acc = acc + b_ref[...]
    acc = jnp.where(acc >= 0.0, acc, negative_slope * acc)   # LeakyReLU(0.01)

    # Width/channel duplication already folded into the duplicated weight
    # columns; height duplication = two plain stores (no duplicated vreg
    # intermediate).  Output is bf16.
    y = acc.astype(o_ref.dtype).reshape(h_tile, w_out, 2 * c)
    o_ref[0, :, 0] = y
    o_ref[0, :, 1] = y


def _tpu_generation():
    """Best-effort TPU generation (5 / 6 / 7); 0 if unknown."""
    try:
        kind = jax.devices()[0].device_kind.lower()
    except Exception:  # pragma: no cover - defensive
        return 0
    if "v5" in kind:
        return 5
    if "v6" in kind:
        return 6
    if "7" in kind:
        return 7
    return 0


def _pick_h_tile(n, h, w, c, *, tpu_gen):
    """Largest divisor of H whose per-step VMEM footprint fits the budget."""
    # Rough per-row VMEM bytes: double-buffered bf16 in/out blocks + the
    # in-kernel bf16 im2col slab + f32 accumulator.
    per_row = (2 * 2 * (w + 2) * c      # input block, 2x buffered, bf16
               + 2 * 8 * w * c          # output block (x2 h-dup, 2C), 2x buf
               + 18 * w * c             # merged K=9C slab, bf16
               + 6 * w * c              # hoisted 3-tap slab, bf16
               + 8 * w * c)             # f32 accumulator
    if tpu_gen == 7:
        budget = 24 << 20   # v7x: 32 MiB scoped / 64 MiB physical VMEM
    elif tpu_gen in (5, 6):
        budget = 80 << 20   # v5e/v6e: 128 MiB physical; scoped limit raised
    else:
        budget = 12 << 20   # unknown chip: stay under default scoped VMEM
    best = 1
    for t in range(1, h + 1):
        if h % t == 0 and t * per_row <= budget:
            best = t
    # Only v7x has 2 TensorCores; splitting on 1-TC chips just adds overhead.
    if tpu_gen == 7 and n == 1 and best == h and h % 2 == 0:
        best = h // 2
    # TODO(synk): for very wide images (W >= 512) add a W tile with a 1-column
    # halo instead of letting h_tile collapse to 1.
    return best


def upblock_forward(x_nchw, weight_oihw, bias, *, h_tile=None,
                    negative_slope=0.01, out_format="NCHW"):
    """UpBlock forward: NCHW f32 in -> bf16 out (NCHW by default, 2x upsample).

    out_format="NHWC" skips the final back-transpose entirely (use it when the
    consumer -- e.g. the next Pallas stage -- can take channels-last).
    """
    n, c, h, w = x_nchw.shape
    co, ci, kh, kw = weight_oihw.shape
    assert (co, ci, kh, kw) == (c, c, 3, 3)

    tpu_gen = _tpu_generation()
    if h_tile is None:
        h_tile = _pick_h_tile(n, h, w, c, tpu_gen=tpu_gen)
    assert h % h_tile == 0
    r = h // h_tile

    # NCHW -> NHWC (channels on the 128-lane axis), bf16 for the MXU, zero
    # pad H/W by 1.  No haloed-slab copy: the kernel reads this array directly.
    x = jnp.transpose(x_nchw, (0, 2, 3, 1)).astype(jnp.bfloat16)
    xp = jnp.pad(x, ((0, 0), (1, 1), (1, 1), (0, 0)))   # (N, H+2, W+2, C)

    # OIHW -> (9*Cin, Cout), then duplicate the output columns so the MXU
    # emits the lane-dense width/channel-duplicated (M, 2*Cout) tile directly.
    w9 = jnp.transpose(weight_oihw, (2, 3, 1, 0)).reshape(9 * c, c)
    w9 = jnp.concatenate([w9, w9], axis=-1).astype(jnp.bfloat16)   # (9C, 2C)
    b2 = jnp.concatenate([bias, bias]).reshape(1, 2 * c).astype(jnp.float32)

    kernel = functools.partial(_upblock_kernel, h_tile=h_tile, w_out=w, c=c,
                               negative_slope=negative_slope)

    compiler_kwargs = dict(dimension_semantics=("parallel", "parallel"))
    if tpu_gen in (5, 6):
        # 128 MiB physical VMEM on these gens; allow bigger pipelined blocks.
        compiler_kwargs["vmem_limit_bytes"] = 100 * 1024 * 1024

    out = pl.pallas_call(
        kernel,
        out_shape=jax.ShapeDtypeStruct((n, h, 2, w, 2 * c), jnp.bfloat16),
        grid=(n, r),
        in_specs=[
            # Main block: padded rows [j*h_tile, (j+1)*h_tile).
            pl.BlockSpec((1, h_tile, w + 2, c), lambda i, j: (i, j, 0, 0)),
            # Two single-row halo blocks (block size 1 => block index == row),
            # auto-pipelined like everything else; total input re-read is only
            # (h_tile+2)/h_tile, with no wrapper-side copy.
            pl.BlockSpec((1, 1, w + 2, c),
                         lambda i, j: (i, (j + 1) * h_tile, 0, 0)),
            pl.BlockSpec((1, 1, w + 2, c),
                         lambda i, j: (i, (j + 1) * h_tile + 1, 0, 0)),
            pl.BlockSpec((9 * c, 2 * c), lambda i, j: (0, 0)),
            pl.BlockSpec((1, 2 * c), lambda i, j: (0, 0)),
        ],
        out_specs=pl.BlockSpec((1, h_tile, 2, w, 2 * c),
                               lambda i, j: (i, j, 0, 0, 0)),
        compiler_params=pltpu.CompilerParams(**compiler_kwargs),
    )(xp, xp, xp, w9, b2)

    # Free row-major reshape: (N, H, 2, W, 2C) -> (N, 2H, 2W, C), bf16.
    out = out.reshape(n, 2 * h, 2 * w, c)
    if out_format == "NHWC":
        return out
    # NCHW parity with the PyTorch module; done in bf16 (half the old bytes).
    return jnp.transpose(out, (0, 3, 1, 2))


def upblock_reference(x, weight, bias, negative_slope=0.01):
    """Pure-JAX f32 reference matching the PyTorch module."""
    y = lax.conv_general_dilated(
        x, weight, window_strides=(1, 1), padding=((1, 1), (1, 1)),
        dimension_numbers=("NCHW", "OIHW", "NCHW"),
        precision=lax.Precision.HIGHEST)
    y = y + bias[None, :, None, None]
    y = jnp.where(y >= 0.0, y, negative_slope * y)
    return jnp.repeat(jnp.repeat(y, 2, axis=2), 2, axis=3)


if __name__ == "__main__":
    key = jax.random.PRNGKey(0)
    kx, kw, kb = jax.random.split(key, 3)
    batch, filters, hh, ww = 2, 64, 16, 16   # ESRGAN UpBlock uses 64 filters
    x = jax.random.normal(kx, (batch, filters, hh, ww), jnp.float32)
    weight = jax.random.normal(kw, (filters, filters, 3, 3), jnp.float32) * (
        (2.0 / (9 * filters)) ** 0.5)
    bias = jax.random.normal(kb, (filters,), jnp.float32) * 0.01

    y_ref = upblock_reference(x, weight, bias)

    # Auto-picked tile (chip-generation-aware policy).
    y = jax.block_until_ready(jax.jit(upblock_forward)(x, weight, bias))
    assert y.shape == (batch, filters, 2 * hh, 2 * ww), y.shape
    y32 = y.astype(jnp.float32)
    assert bool(jnp.all(jnp.isfinite(y32)))
    # bf16 MXU inputs + bf16 output with f32 accumulation -> ~1e-2 error budget.
    assert bool(jnp.allclose(y32, y_ref, rtol=5e-2, atol=5e-2)), (
        float(jnp.max(jnp.abs(y32 - y_ref))))

    # Multi-row-tile path (exercises the halo-row BlockSpecs across tiles).
    fwd8 = jax.jit(functools.partial(upblock_forward, h_tile=8))
    y8 = jax.block_until_ready(fwd8(x, weight, bias)).astype(jnp.float32)
    assert bool(jnp.allclose(y8, y_ref, rtol=5e-2, atol=5e-2)), (
        float(jnp.max(jnp.abs(y8 - y_ref))))

    print("KERNEL_OK")
</pallas_src>

<mosaic_0001>
module attributes {stable_mosaic.version = 11 : i64} {
  func.func @_upblock_kernel(%arg0: i32, %arg1: i32, %arg2: memref<1x16x18x64xbf16, #tpu.memory_space<vmem>>, %arg3: memref<1x1x18x64xbf16, #tpu.memory_space<vmem>>, %arg4: memref<1x1x18x64xbf16, #tpu.memory_space<vmem>>, %arg5: memref<576x128xbf16, #tpu.memory_space<vmem>>, %arg6: memref<1x128xf32, #tpu.memory_space<vmem>>, %arg7: memref<1x16x2x16x128xbf16, #tpu.memory_space<vmem>>) attributes {dimension_semantics = [#tpu.dimension_semantics<parallel>, #tpu.dimension_semantics<parallel>], iteration_bounds = array<i64: 2, 1>, scalar_prefetch = 0 : i64, scratch_operands = 0 : i64, tpu.core_type = #tpu.core_type<tc>, window_params = [{transform_indices = @transform_0, window_bounds = array<i64: 1, 16, 18, 64>}, {transform_indices = @transform_1, window_bounds = array<i64: 1, 1, 18, 64>}, {transform_indices = @transform_2, window_bounds = array<i64: 1, 1, 18, 64>}, {pipeline_mode = #tpu.pipeline_mode<synchronous>, transform_indices = @transform_3, window_bounds = array<i64: 576, 128>}, {pipeline_mode = #tpu.pipeline_mode<synchronous>, transform_indices = @transform_4, window_bounds = array<i64: 1, 128>}, {transform_indices = @transform_5, window_bounds = array<i64: 1, 16, 2, 16, 128>}]} {
    %c0 = arith.constant 0 : index
    %c0_0 = arith.constant 0 : index
    %c0_1 = arith.constant 0 : index
    %c0_2 = arith.constant 0 : index
    %0 = vector.load %arg2[%c0, %c0_0, %c0_1, %c0_2] : memref<1x16x18x64xbf16, #tpu.memory_space<vmem>>, vector<1x16x18x64xbf16>
    %1 = vector.shape_cast %0 : vector<1x16x18x64xbf16> to vector<16x18x64xbf16>
    %c0_3 = arith.constant 0 : index
    %c0_4 = arith.constant 0 : index
    %c0_5 = arith.constant 0 : index
    %c0_6 = arith.constant 0 : index
    %2 = vector.load %arg3[%c0_3, %c0_4, %c0_5, %c0_6] : memref<1x1x18x64xbf16, #tpu.memory_space<vmem>>, vector<1x1x18x64xbf16>
    %3 = vector.shape_cast %2 : vector<1x1x18x64xbf16> to vector<1x18x64xbf16>
    %c0_7 = arith.constant 0 : index
    %c0_8 = arith.constant 0 : index
    %c0_9 = arith.constant 0 : index
    %c0_10 = arith.constant 0 : index
    %4 = vector.load %arg4[%c0_7, %c0_8, %c0_9, %c0_10] : memref<1x1x18x64xbf16, #tpu.memory_space<vmem>>, vector<1x1x18x64xbf16>
    %5 = vector.shape_cast %4 : vector<1x1x18x64xbf16> to vector<1x18x64xbf16>
    %6 = tpu.concatenate %1, %3, %5 in 0 : vector<16x18x64xbf16>, vector<1x18x64xbf16>, vector<1x18x64xbf16> -> vector<18x18x64xbf16>
    %7 = vector.extract_strided_slice %6 {offsets = [0, 0, 0], sizes = [18, 16, 64], strides = [1, 1, 1]} : vector<18x18x64xbf16> to vector<18x16x64xbf16>
    %8 = vector.extract_strided_slice %6 {offsets = [0, 1, 0], sizes = [18, 16, 64], strides = [1, 1, 1]} : vector<18x18x64xbf16> to vector<18x16x64xbf16>
    %9 = vector.extract_strided_slice %6 {offsets = [0, 2, 0], sizes = [18, 16, 64], strides = [1, 1, 1]} : vector<18x18x64xbf16> to vector<18x16x64xbf16>
    %10 = tpu.concatenate %7, %8, %9 in 2 : vector<18x16x64xbf16>, vector<18x16x64xbf16>, vector<18x16x64xbf16> -> vector<18x16x192xbf16>
    %11 = vector.extract_strided_slice %10 {offsets = [0, 0, 0], sizes = [16, 16, 192], strides = [1, 1, 1]} : vector<18x16x192xbf16> to vector<16x16x192xbf16>
    %12 = vector.extract_strided_slice %10 {offsets = [1, 0, 0], sizes = [16, 16, 192], strides = [1, 1, 1]} : vector<18x16x192xbf16> to vector<16x16x192xbf16>
    %13 = vector.extract_strided_slice %10 {offsets = [2, 0, 0], sizes = [16, 16, 192], strides = [1, 1, 1]} : vector<18x16x192xbf16> to vector<16x16x192xbf16>
    %14 = tpu.concatenate %11, %12, %13 in 2 : vector<16x16x192xbf16>, vector<16x16x192xbf16>, vector<16x16x192xbf16> -> vector<16x16x576xbf16>
    %15 = vector.shape_cast %14 : vector<16x16x576xbf16> to vector<256x576xbf16>
    %c0_11 = arith.constant 0 : index
    %c0_12 = arith.constant 0 : index
    %16 = vector.load %arg5[%c0_11, %c0_12] : memref<576x128xbf16, #tpu.memory_space<vmem>>, vector<576x128xbf16>
    %cst = arith.constant dense<0.000000e+00> : vector<256x128xf32>
    %17 = tpu.matmul %15, %16, %cst {dimension_numbers = #tpu.dot_dimension_numbers<[1], [0], [0], [1], [0, 0, 1, 1], [], []>} : vector<256x576xbf16>, vector<576x128xbf16>, vector<256x128xf32> -> vector<256x128xf32>
    %c0_13 = arith.constant 0 : index
    %c0_14 = arith.constant 0 : index
    %18 = vector.load %arg6[%c0_13, %c0_14] : memref<1x128xf32, #tpu.memory_space<vmem>>, vector<1x128xf32>
    %19 = vector.broadcast %18 : vector<1x128xf32> to vector<256x128xf32>
    %20 = arith.addf %17, %19 : vector<256x128xf32>
    %cst_15 = arith.constant 0.000000e+00 : f32
    %21 = vector.broadcast %cst_15 : f32 to vector<256x128xf32>
    %22 = arith.cmpf oge, %20, %21 : vector<256x128xf32>
    %cst_16 = arith.constant 0.00999999977 : f32
    %23 = vector.broadcast %cst_16 : f32 to vector<256x128xf32>
    %24 = arith.mulf %23, %20 : vector<256x128xf32>
    %25 = arith.select %22, %20, %24 : vector<256x128xi1>, vector<256x128xf32>
    %26 = arith.truncf %25 : vector<256x128xf32> to vector<256x128xbf16>
    %27 = vector.shape_cast %26 : vector<256x128xbf16> to vector<16x16x128xbf16>
    %c0_17 = arith.constant 0 : index
    %c0_18 = arith.constant 0 : index
    %c0_19 = arith.constant 0 : index
    %c0_20 = arith.constant 0 : index
    %c0_21 = arith.constant 0 : index
    %28 = vector.load %arg7[%c0_17, %c0_18, %c0_19, %c0_20, %c0_21] : memref<1x16x2x16x128xbf16, #tpu.memory_space<vmem>>, vector<1x16x1x16x128xbf16>
    %29 = vector.shape_cast %28 : vector<1x16x1x16x128xbf16> to vector<16x16x128xbf16>
    %30 = vector.shape_cast %27 : vector<16x16x128xbf16> to vector<1x16x1x16x128xbf16>
    tpu.vector_store %arg7[%c0_17, %c0_18, %c0_19, %c0_20, %c0_21], %30 {strides = array<i32>} : memref<1x16x2x16x128xbf16, #tpu.memory_space<vmem>>, vector<1x16x1x16x128xbf16>,
    %c0_22 = arith.constant 0 : index
    %c0_23 = arith.constant 0 : index
    %c1 = arith.constant 1 : index
    %c0_24 = arith.constant 0 : index
    %c0_25 = arith.constant 0 : index
    %31 = vector.load %arg7[%c0_22, %c0_23, %c1, %c0_24, %c0_25] : memref<1x16x2x16x128xbf16, #tpu.memory_space<vmem>>, vector<1x16x1x16x128xbf16>
    %32 = vector.shape_cast %31 : vector<1x16x1x16x128xbf16> to vector<16x16x128xbf16>
    %33 = vector.shape_cast %27 : vector<16x16x128xbf16> to vector<1x16x1x16x128xbf16>
    tpu.vector_store %arg7[%c0_22, %c0_23, %c1, %c0_24, %c0_25], %33 {strides = array<i32>} : memref<1x16x2x16x128xbf16, #tpu.memory_space<vmem>>, vector<1x16x1x16x128xbf16>,
    return
  }
  func.func @transform_0(%arg0: i32, %arg1: i32) -> (i32, i32, i32, i32) {
    %c0_i32 = arith.constant 0 : i32
    %c0_i32_0 = arith.constant 0 : i32
    %c0_i32_1 = arith.constant 0 : i32
    return %arg0, %arg1, %c0_i32, %c0_i32_0 : i32, i32, i32, i32
  }
  func.func @transform_1(%arg0: i32, %arg1: i32) -> (i32, i32, i32, i32) {
    %c1_i32 = arith.constant 1 : i32
    %0 = arith.addi %arg1, %c1_i32 : i32
    %c16_i32 = arith.constant 16 : i32
    %1 = arith.muli %0, %c16_i32 : i32
    %c0_i32 = arith.constant 0 : i32
    %c0_i32_0 = arith.constant 0 : i32
    %c0_i32_1 = arith.constant 0 : i32
    return %arg0, %1, %c0_i32, %c0_i32_0 : i32, i32, i32, i32
  }
  func.func @transform_2(%arg0: i32, %arg1: i32) -> (i32, i32, i32, i32) {
    %c1_i32 = arith.constant 1 : i32
    %0 = arith.addi %arg1, %c1_i32 : i32
    %c16_i32 = arith.constant 16 : i32
    %1 = arith.muli %0, %c16_i32 : i32
    %c1_i32_0 = arith.constant 1 : i32
    %2 = arith.addi %1, %c1_i32_0 : i32
    %c0_i32 = arith.constant 0 : i32
    %c0_i32_1 = arith.constant 0 : i32
    %c0_i32_2 = arith.constant 0 : i32
    return %arg0, %2, %c0_i32, %c0_i32_1 : i32, i32, i32, i32
  }
  func.func @transform_3(%arg0: i32, %arg1: i32) -> (i32, i32) {
    %c0_i32 = arith.constant 0 : i32
    %c0_i32_0 = arith.constant 0 : i32
    %c0_i32_1 = arith.constant 0 : i32
    return %c0_i32, %c0_i32_0 : i32, i32
  }
  func.func @transform_4(%arg0: i32, %arg1: i32) -> (i32, i32) {
    %c0_i32 = arith.constant 0 : i32
    %c0_i32_0 = arith.constant 0 : i32
    %c0_i32_1 = arith.constant 0 : i32
    return %c0_i32, %c0_i32_0 : i32, i32
  }
  func.func @transform_5(%arg0: i32, %arg1: i32) -> (i32, i32, i32, i32, i32) {
    %c0_i32 = arith.constant 0 : i32
    %c0_i32_0 = arith.constant 0 : i32
    %c0_i32_1 = arith.constant 0 : i32
    %c0_i32_2 = arith.constant 0 : i32
    return %arg0, %arg1, %c0_i32, %c0_i32_0, %c0_i32_1 : i32, i32, i32, i32, i32
  }
}

</mosaic_0001>

<bundles_post_ra>
// kernel: upblock_forward.1
= control target key start
LH: loop header
LB: loop body
LE: loop exit
PB: predicated region body
PF: predicated region fallthrough
CT: control target
= control target key end

     0   :  { %s3223_s18 = smov 0   ;;  %s3225_s19 = smov 0   ;;  %s4124_s0 = inlined_call_operand.vmem [shape: bf16[2,18,18,64], index: 0, kind: input, shape index: {}, may-alias: {0,1,2}]   ;;  %s4125_s1 = inlined_call_operand.vmem [shape: bf16[2,18,18,64], index: 1, kind: input, shape index: {}, may-alias: {0,1,2}]   ;;  %s4126_s2 = inlined_call_operand.vmem [shape: bf16[2,18,18,64], index: 2, kind: input, shape index: {}, may-alias: {0,1,2}]   ;;  %s4127_s3 = inlined_call_operand.vmem [shape: bf16[576,128], index: 3, kind: input, shape index: {}]   ;;  %s4128_s4 = inlined_call_operand.vmem [shape: f32[1,128], index: 4, kind: input, shape index: {}]   ;;  %s4129_s5 = inlined_call_operand.vmem [shape: bf16[2,16,2,16,128], index: 5, kind: output, shape index: {}]  }
   0x1   :  { %s3227_s20 = smov 0  }
   0x2 LB: > { %s27_s21 = sadd.s32 1, %s3186_s19  ;;  %p2379_p0 = scmp.ge.s32.totalorder %s3190_s20, 1  ;;  %s3190_s20 = sphi %s3227_s20, %s15_s20   ;;  %s3186_s19 = sphi %s3225_s19, %s4131_s19   ;;  %s3182_s18 = sphi %s3223_s18, %s4130_s18  }
   0x3   : > { %p29_p1 = scmp.ge.s32.totalorder %s27_s21, 2  ;;  %p271_p2 = scmp.lt.s32.totalorder %s3190_s20, 3 }
   0x5   : > { %s4133_s21 = smov (%p29_p1, %s27_s21), 0  ;;  %p272_p3 = pnand %p2379_p0, %p271_p2 }
   0x6   : > { %p343_p4 = scmp.lt.s32.totalorder (!%p272_p3), %s3182_s18, 1  ;;  %vm596_vm0 = vsmask.f32 (!%p272_p3), 7424  ;;  %s3192_s27 = smov (!%p272_p3), 64   ;;  %vm904_vm1 = vcmask (!%p272_p3), 523264   ;;  %vm849_vm2 = vcmask (!%p272_p3), 1046528  }
   0x7   : > { %275 = sbr.rel (%p272_p3) target bundleno = 698 (0x2ba), region = 40 }
   0xe   : > { %s4135_s18 = smov (!%p343_p4, %s3182_s18), 1 }
   0xf   : > { %s3244_s22 = smul.u32 216, %s4135_s18  ;;  %s2544_s6 = sshll.u32 %s4135_s18, 8 }
  0x10   : > { %s4023_s9 = scalar_lea.vmem %s4129_s5, %s2544_s6 }
  0x11   : > { %s3250_s25 = scalar_lea.vmem %s4124_s0, %s3244_s22  ;;  %s2541_s26 = sadd.s32 192, %s3244_s22 }
  0x12   : > { %v3253_v0 = vld [vmem:[%s3250_s25 + $0x9c] sm:$0xff]   ;;  %v3256_v1 = vld [vmem:[%s3250_s25 + $0xa4] ss:$0 sps:$4 sm:$0x11]   ;;  %v3259_v2 = vld [vmem:[%s3250_s25 + $0xc] sm:$0xff]   ;;  %s368_s30 = scalar_lea.vmem %s4125_s1, %s2541_s26 }
  0x13   : > { %v754_v3 = vshrl.u32 %v3253_v0, 16  ;;  %v756_v4 = vshll.u32 %v3253_v0, 16  ;;  %v761_v5 = vshll.u32 %v3256_v1, 16  ;;  %v3266_v6 = vld [vmem:[%s3250_s25 + $0x14] ss:$0 sps:$4 sm:$0x11]  }
  0x14   : > { %v610_v7 = vshrl.u32 %v3259_v2, 16  ;;  %v612_v8 = vshll.u32 %v3259_v2, 16  ;;  %v617_v11 = vshll.u32 %v3266_v6, 16  ;;  %v3272_v12 = vld [vmem:[%s3250_s25 + $0xa8] sm:$0xff]   ;;  %v3280_v19 = vld [vmem:[%s3250_s25 + $0x18] sm:$0xff]   ;;  %v3317_v45 = vld [vmem:[%s368_s30] sm:$0xff]  }
  0x15   : > { %v758_v9 = vrot.slane %v756_v4, 1  ;;  %v763_v10 = vrot.slane %v761_v5, 1  ;;  %v3275_v14 = vld [vmem:[%s3250_s25 + $0xb0] ss:$0 sps:$4 sm:$0x11]   ;;  %v766_v17 = vshrl.u32 %v3272_v12, 16 }
  0x16   : > { %v614_v13 = vrot.slane %v612_v8, 1  ;;  %v619_v16 = vrot.slane %v617_v11, 1  ;;  %v768_v18 = vshll.u32 %v3272_v12, 16  ;;  %v773_v21 = vshll.u32 %v3275_v14, 16  ;;  %v3290_v27 = vld [vmem:[%s3250_s25 + $0xb4] sm:$0xff]   ;;  %v3306_v37 = vld [vmem:[%s3250_s25 + $0x24] sm:$0xff]  }
  0x17   : > { %v759_v15 = vor.u32 %v758_v9, %v754_v3  ;;  %v3284_v22 = vld [vmem:[%s3250_s25 + $0x20] ss:$0 sps:$4 sm:$0x11]   ;;  %v622_v25 = vshrl.u32 %v3280_v19, 16  ;;  %v624_v26 = vshll.u32 %v3280_v19, 16  ;;  %v778_v34 = vshrl.u32 %v3290_v27, 16 }
  0x18   : > { %v615_v20 = vor.u32 %v614_v13, %v610_v7  ;;  %v770_v24 = vrot.slane %v768_v18, 1  ;;  %v775_v29 = vrot.slane %v773_v21, 1  ;;  %v629_v30 = vshll.u32 %v3284_v22, 16  ;;  %v3296_v33 = vld [vmem:[%s3250_s25 + $0xbc] ss:$0 sps:$4 sm:$0x11]  }
  0x19   : > { %v764_v23 = vsel %vm596_vm0, %v759_v15, %v763_v10  ;;  %v626_v32 = vrot.slane %v624_v26, 1  ;;  %v780_v35 = vshll.u32 %v3290_v27, 16  ;;  %v785_v41 = vshll.u32 %v3296_v33, 16  ;;  %v3313_v42 = vld [vmem:[%s3250_s25 + $0x2c] ss:$0 sps:$4 sm:$0x11]  }
  0x1a   : > { %839 = vrot.lane.b32.xlu0 %v764_v23, %s3192_s27  ;;  %v620_v28 = vsel %vm596_vm0, %v615_v20, %v619_v16  ;;  %v771_v31 = vor.u32 %v770_v24, %v766_v17  ;;  %v631_v36 = vrot.slane %v629_v30, 1  ;;  %v634_v43 = vshrl.u32 %v3306_v37, 16  ;;  %v3321_v49 = vld [vmem:[%s3250_s25 + $0x30] sm:$0xff]   ;;  %v3324_v52 = vld [vmem:[%s368_s30 + $0x8] ss:$0 sps:$4 sm:$0x11]  }
  0x1b   : > { %v627_v39 = vor.u32 %v626_v32, %v622_v25  ;;  %v782_v40 = vrot.slane %v780_v35, 1  ;;  %v636_v44 = vshll.u32 %v3306_v37, 16  ;;  %v787_v48 = vrot.slane %v785_v41, 1  ;;  %v3335_v61 = vld [vmem:[%s3250_s25 + $0x3c] sm:$0xff]   ;;  %v3351_v20 = vld [vmem:[%s3250_s25 + $0x48] sm:$0xff]   ;;  %v3358_v23 = vld [vmem:[%s3250_s25 + $0x54] sm:$0xff]  }
  0x1c   : > { %v776_v38 = vsel %vm596_vm0, %v771_v31, %v775_v29  ;;  %v641_v51 = vshll.u32 %v3313_v42, 16  ;;  %v790_v53 = vshrl.u32 %v3317_v45, 16  ;;  %v792_v55 = vshll.u32 %v3317_v45, 16  ;;  %v3338_v63 = vld [vmem:[%s3250_s25 + $0x38] ss:$0 sps:$4 sm:$0x11]  }
  0x1d   : > { %841 = vrot.lane.b32.xlu1 %v776_v38, %s3192_s27  ;;  %v632_v46 = vsel %vm596_vm0, %v627_v39, %v631_v36  ;;  %v783_v47 = vor.u32 %v782_v40, %v778_v34  ;;  %v638_v50 = vrot.slane %v636_v44, 1  ;;  %v646_v56 = vshrl.u32 %v3321_v49, 16  ;;  %v3343_v9 = vld [vmem:[%s3250_s25 + $0x44] ss:$0 sps:$4 sm:$0x11]   ;;  %s2543_s30 = sadd.s32 204, %s3244_s22 }
  0x1e   : > { %815 = vrot.lane.b32.xlu0 %v620_v28, %s3192_s27  ;;  %v643_v58 = vrot.slane %v641_v51, 1  ;;  %v797_v59 = vshll.u32 %v3324_v52, 16  ;;  %v648_v60 = vshll.u32 %v3321_v49, 16  ;;  %v794_v62 = vrot.slane %v792_v55, 1  ;;  %v3372_v36 = vld [vmem:[%s3250_s25 + $0x60] sm:$0xff]   ;;  %s3636_s8 = scalar_lea.vmem %s4126_s2, %s2543_s30 }
  0x1f   : > { %v788_v54 = vsel %vm596_vm0, %v783_v47, %v787_v48  ;;  %v639_v57 = vor.u32 %v638_v50, %v634_v43  ;;  %v653_v8 = vshll.u32 %v3338_v63, 16  ;;  %v658_v10 = vshrl.u32 %v3335_v61, 16  ;;  %v3355_v21 = vld [vmem:[%s3250_s25 + $0x50] ss:$0 sps:$4 sm:$0x11]  }
  0x20   : > { %v799_v4 = vrot.slane %v797_v59, 1  ;;  %v650_v5 = vrot.slane %v648_v60, 1  ;;  %v795_v7 = vor.u32 %v794_v62, %v790_v53  ;;  %v660_v11 = vshll.u32 %v3335_v61, 16  ;;  %v3366_v31 = vld [vmem:[%s3250_s25 + $0x5c] ss:$0 sps:$4 sm:$0x11]  }
  0x21   : > { %817 = vrot.lane.b32.xlu1 %v632_v46, %s3192_s27  ;;  %v644_v3 = vsel %vm596_vm0, %v639_v57, %v643_v58  ;;  %v655_v16 = vrot.slane %v653_v8, 1  ;;  %v665_v18 = vshll.u32 %v3343_v9, 16  ;;  %v670_v28 = vshrl.u32 %v3351_v20, 16  ;;  %v3377_v41 = vld [vmem:[%s3250_s25 + $0x68] ss:$0 sps:$4 sm:$0x11]  }
  0x22   : > { %843 = vrot.lane.b32.xlu0 %v788_v54, %s3192_s27  ;;  %v651_v13 = vor.u32 %v650_v5, %v646_v56  ;;  %v800_v15 = vsel %vm596_vm0, %v795_v7, %v799_v4  ;;  %v662_v17 = vrot.slane %v660_v11, 1  ;;  %v672_v29 = vshll.u32 %v3351_v20, 16  ;;  %v3130_v59 = vld [vmem:[%s4127_s3 + $0x40] sm:$0xff]   ;;  %v3132_v62 = vld [vmem:[%s4127_s3 + $0x48] sm:$0xff]   ;;  %v3134_v4 = vld [vmem:[%s4127_s3 + $0x50] sm:$0xff]  }
  0x23   : > { %v667_v26 = vrot.slane %v665_v18, 1  ;;  %v677_v30 = vshll.u32 %v3355_v21, 16  ;;  %v682_v32 = vshrl.u32 %v3358_v23, 16  ;;  %v684_v35 = vshll.u32 %v3358_v23, 16  ;;  %v3131_v60 = vld [vmem:[%s4127_s3] sm:$0xff]   ;;  %3052 = vmatprep.subr.bf16.mxu1 %v3130_v59  ;;  %2768 = vmatprep.subr.bf16.mxu0 %v3130_v59  ;;  %v3135_v5 = vld [vmem:[%s4127_s3 + $0x10] sm:$0xff]  }
  0x24   : > { %v656_v24 = vsel %vm596_vm0, %v651_v13, %v655_v16  ;;  %v663_v25 = vor.u32 %v662_v17, %v658_v10  ;;  %v674_v38 = vrot.slane %v672_v29, 1  ;;  %v689_v40 = vshll.u32 %v3366_v31, 16  ;;  %3060 = vmatpush3.bf16.msra.mxu1 %v3131_v60  ;;  %2769 = vmatpush3.bf16.msra.mxu0 %v3131_v60  ;;  %v3136_v7 = vld [vmem:[%s4127_s3 + $0x58] sm:$0xff]   ;;  %v3138_v10 = vld [vmem:[%s4127_s3 + $0x60] sm:$0xff]   ;;  %v3140_v13 = vld [vmem:[%s4127_s3 + $0x68] sm:$0xff]  }
  0x25   : > { %819 = vrot.lane.b32.xlu1 %v644_v3, %s3192_s27  ;;  %v679_v39 = vrot.slane %v677_v30, 1  ;;  %v686_v43 = vrot.slane %v684_v35, 1  ;;  %v694_v44 = vshrl.u32 %v3372_v36, 16  ;;  %v696_v46 = vshll.u32 %v3372_v36, 16  ;;  %v3133_v3 = vld [vmem:[%s4127_s3 + $0x8] sm:$0xff]   ;;  %3053 = vmatprep.subr.bf16.mxu1 %v3132_v62  ;;  %v3137_v8 = vld [vmem:[%s4127_s3 + $0x18] sm:$0xff]  }
  0x26   : > { %845 = vrot.lane.b32.xlu0 %v800_v15, %s3192_s27  ;;  %v668_v34 = vsel %vm596_vm0, %v663_v25, %v667_v26  ;;  %v675_v47 = vor.u32 %v674_v38, %v670_v28  ;;  %v691_v48 = vrot.slane %v689_v40, 1  ;;  %v701_v50 = vshll.u32 %v3377_v41, 16  ;;  %2770 = vmatprep.subr.bf16.mxu0 %v3132_v62  ;;  %v3139_v11 = vld [vmem:[%s4127_s3 + $0x20] sm:$0xff]   ;;  %v3141_v15 = vld [vmem:[%s4127_s3 + $0x28] sm:$0xff]   ;;  %v3142_v16 = vld [vmem:[%s4127_s3 + $0x70] sm:$0xff]  }
  0x27   : > { %v687_v51 = vor.u32 %v686_v43, %v682_v32  ;;  %v698_v53 = vrot.slane %v696_v46, 1  ;;  %v3143_v17 = vld [vmem:[%s4127_s3 + $0x30] sm:$0xff]   ;;  %v3145_v25 = vld [vmem:[%s4127_s3 + $0x38] sm:$0xff]   ;;  %v3440_v26 = vld [vmem:[%s3250_s25] sm:$0xff]  }
  0x28   : > { %v680_v54 = vsel %vm596_vm0, %v675_v47, %v679_v39  ;;  %v703_v55 = vrot.slane %v701_v50, 1  ;;  %3061 = vmatpush3.bf16.msra.mxu1 %v3133_v3  ;;  %2771 = vmatpush3.bf16.msra.mxu0 %v3133_v3  ;;  %v3431_v18 = vld [vmem:[%s3250_s25 + $0x90] sm:$0xff]   ;;  %v3443_v28 = vld [vmem:[%s3250_s25 + $0x98] ss:$0 sps:$4 sm:$0x11]   ;;  %v3146_v30 = vld [vmem:[%s4127_s3 + $0xc0] sm:$0xff]  }
  0x29   : > { %821 = vrot.lane.b32.xlu1 %v656_v24, %s3192_s27  ;;  %v692_v56 = vsel %vm596_vm0, %v687_v51, %v691_v48  ;;  %v699_v57 = vor.u32 %v698_v53, %v694_v44  ;;  %3054 = vmatprep.subr.bf16.mxu1 %v3134_v4  ;;  %v3144_v24 = vld [vmem:[%s4127_s3 + $0x78] sm:$0xff]   ;;  %v744_v29 = vshll.u32 %v3431_v18, 16  ;;  %v3450_v32 = vld [vmem:[%s3250_s25 + $0x8] ss:$0 sps:$4 sm:$0x11]   ;;  %v742_v35 = vshrl.u32 %v3431_v18, 16 }
  0x2a   : > { %823 = vrot.lane.b32.xlu0 %v668_v34, %s3192_s27  ;;  %2772 = vmatprep.subr.bf16.mxu0 %v3134_v4  ;;  %v600_v34 = vshll.u32 %v3440_v26, 16  ;;  %v749_v39 = vshll.u32 %v3443_v28, 16  ;;  %v3456_v40 = vld [vmem:[%s3250_s25 + $0x6c] sm:$0xff]   ;;  %v598_v43 = vshrl.u32 %v3440_v26, 16  ;;  %v605_v46 = vshll.u32 %v3450_v32, 16  ;;  %v3465_v53 = vld [vmem:[%s3250_s25 + $0x78] sm:$0xff]  }
  0x2b   : > { %v704_v58 = vsel %vm596_vm0, %v699_v57, %v703_v55  ;;  %v746_v38 = vrot.slane %v744_v29, 1  ;;  %v3461_v47 = vld [vmem:[%s3250_s25 + $0x74] ss:$0 sps:$4 sm:$0x11]   ;;  %v708_v51 = vshll.u32 %v3456_v40, 16  ;;  %v706_v60 = vshrl.u32 %v3456_v40, 16 }
  0x2c   : > { %3062 = vmatpush3.bf16.msra.mxu1 %v3135_v5  ;;  %2773 = vmatpush3.bf16.msra.mxu0 %v3135_v5  ;;  %v602_v44 = vrot.slane %v600_v34, 1  ;;  %v751_v50 = vrot.slane %v749_v39, 1  ;;  %v607_v57 = vrot.slane %v605_v46, 1  ;;  %v3477_v3 = vld [vmem:[%s3250_s25 + $0x80] ss:$0 sps:$4 sm:$0x11]  }
  0x2d   : > { %825 = vrot.lane.b32.xlu1 %v680_v54, %s3192_s27  ;;  %3055 = vmatprep.subr.bf16.mxu1 %v3136_v7  ;;  %v747_v48 = vor.u32 %v746_v38, %v742_v35  ;;  %v710_v62 = vrot.slane %v708_v51, 1  ;;  %v720_v4 = vshll.u32 %v3465_v53, 16 }
  0x2e   : > { %827 = vrot.lane.b32.xlu0 %v692_v56, %s3192_s27  ;;  %2774 = vmatprep.subr.bf16.mxu0 %v3136_v7  ;;  %v603_v56 = vor.u32 %v602_v44, %v598_v43  ;;  %v3507_v43 = vld [vmem:[%s3250_s25 + $0x8c] ss:$0 sps:$4 sm:$0x11]  }
  0x2f   : > { %v752_v59 = vsel %vm596_vm0, %v747_v48, %v751_v50 }
  0x30   : > { %3063 = vmatpush3.bf16.msra.mxu1 %v3137_v8  ;;  %2775 = vmatpush3.bf16.msra.mxu0 %v3137_v8 }
  0x31   : > { %3056 = vmatprep.subr.bf16.mxu1 %v3138_v10  ;;  %2776 = vmatprep.subr.bf16.mxu0 %v3138_v10  ;;  %v608_v10 = vsel %vm596_vm0, %v603_v56, %v607_v57 }
  0x32   : > { %829 = vrot.lane.b32.xlu0 %v704_v58, %s3192_s27  ;;  %v713_v58 = vshll.u32 %v3461_v47, 16 }
  0x34   : > { %3064 = vmatpush3.bf16.msra.mxu1 %v3139_v11  ;;  %2777 = vmatpush3.bf16.msra.mxu0 %v3139_v11  ;;  %v715_v11 = vrot.slane %v713_v58, 1 }
  0x35   : > { %3057 = vmatprep.subr.bf16.mxu1 %v3140_v13  ;;  %2778 = vmatprep.subr.bf16.mxu0 %v3140_v13  ;;  %v718_v13 = vshrl.u32 %v3465_v53, 16 }
  0x38   : > { %3065 = vmatpush3.bf16.msra.mxu1 %v3141_v15  ;;  %2779 = vmatpush3.bf16.msra.mxu0 %v3141_v15  ;;  %v3490_v15 = vld [vmem:[%s3250_s25 + $0x84] sm:$0xff]  }
  0x39   : > { %3058 = vmatprep.subr.bf16.mxu1 %v3142_v16  ;;  %2780 = vmatprep.subr.bf16.mxu0 %v3142_v16  ;;  %v730_v46 = vshrl.u32 %v3490_v15, 16 }
  0x3c   : > { %3066 = vmatpush3.bf16.msra.mxu1 %v3143_v17  ;;  %2781 = vmatpush3.bf16.msra.mxu0 %v3143_v17  ;;  %v711_v17 = vor.u32 %v710_v62, %v706_v60 }
  0x3d   : > { %3059 = vmatprep.subr.bf16.mxu1 %v3144_v24  ;;  %2782 = vmatprep.subr.bf16.mxu0 %v3144_v24  ;;  %v722_v24 = vrot.slane %v720_v4, 1 }
  0x3e   : > { %v716_v34 = vsel %vm596_vm0, %v711_v17, %v715_v11 }
  0x3f   : > { %v723_v38 = vor.u32 %v722_v24, %v718_v13  ;;  %v856_v24 = vrot.slane %v3280_v19, 1 }
  0x40   : > { %3067 = vmatpush3.bf16.msra.mxu1 %v3145_v25  ;;  %2783 = vmatpush3.bf16.msra.mxu0 %v3145_v25  ;;  %v725_v25 = vshll.u32 %v3477_v3, 16 }
  0x41   : > { %2880 = vmatprep.subr.bf16.mxu1 %v3146_v30  ;;  %v732_v30 = vshll.u32 %v3490_v15, 16 }
  0x42   : > { %v727_v39 = vrot.slane %v725_v25, 1 }
  0x43   : > { %v734_v51 = vrot.slane %v732_v30, 1  ;;  %v859_v30 = vrot.slane %v3306_v37, 1 }
  0x44   : > { %v728_v50 = vsel %vm596_vm0, %v723_v38, %v727_v39  ;;  %v862_v39 = vrot.slane %v3321_v49, 1 }
  0x8c   : > { %v840_v54 = vpop.permute.xlu0 %839 }
  0x8d   : > { %v3469_v55 = vsel %vm904_vm1, %v3253_v0, %v840_v54  ;;  %v737_v54 = vshll.u32 %v3507_v43, 16 }
  0x8e   : > { %1023 = vrot.lane.b32.xlu1 %v3469_v55, %s3192_s27 }
  0x8f   : > { %v842_v7 = vpop.permute.xlu1 %841  ;;  %v739_v60 = vrot.slane %v737_v54, 1  ;;  %v868_v54 = vrot.slane %v3351_v20, 1 }
  0x90   : > { %v816_v5 = vpop.permute.xlu0 %815  ;;  %v3494_v16 = vsel %vm904_vm1, %v3272_v12, %v842_v7  ;;  %v853_v7 = vrot.slane %v3259_v2, 1 }
  0x91   : > { %v3482_v8 = vsel %vm904_vm1, %v3259_v2, %v816_v5  ;;  %v857_v2 = vrot.slane %v3284_v22, 1 }
  0x92   : > { %837 = vrot.lane.b32.xlu1 %v752_v59, %s3192_s27  ;;  %975 = vrot.lane.b32.xlu0 %v3482_v8, %s3192_s27  ;;  %v735_v59 = vor.u32 %v734_v51, %v730_v46 }
  0x93   : > { %v818_v29 = vpop.permute.xlu1 %817 }
  0x94   : > { %v3504_v35 = vsel %vm904_vm1, %v3280_v19, %v818_v29  ;;  %v844_v44 = vpop.permute.xlu0 %843  ;;  %v740_v5 = vsel %vm596_vm0, %v735_v59, %v739_v60  ;;  %v3558_v29 = vsel %vm849_vm2, %v856_v24, %v857_v2  ;;  %v860_v19 = vrot.slane %v3313_v42, 1  ;;  %v3162_v60 = vld [vmem:[%s4127_s3 + $0x100] sm:$0xff]  }
  0x95   : > { %v3515_v48 = vsel %vm904_vm1, %v3290_v27, %v844_v44  ;;  %3012 = vmatprep.subr.bf16.mxu0 %v3162_v60  ;;  %v896_v24 = vrot.slane %v3296_v33, 1  ;;  %v887_v33 = vrot.slane %v3443_v28, 1  ;;  %v3147_v28 = vld [vmem:[%s4127_s3 + $0x80] sm:$0xff]  }
  0x96   : > { %813 = vrot.lane.b32.xlu1 %v608_v10, %s3192_s27  ;;  %1027 = vrot.lane.b32.xlu0 %v3494_v16, %s3192_s27  ;;  %v854_v10 = vrot.slane %v3266_v6, 1  ;;  %v3571_v38 = vsel %vm849_vm2, %v859_v30, %v860_v19 }
  0x97   : > { %v820_v56 = vpop.permute.xlu1 %819 }
  0x98   : > { %v846_v57 = vpop.permute.xlu0 %845  ;;  %v3524_v58 = vsel %vm904_vm1, %v3306_v37, %v820_v56  ;;  %v3545_v17 = vsel %vm849_vm2, %v853_v7, %v854_v10  ;;  %v863_v37 = vrot.slane %v3338_v63, 1  ;;  %v869_v56 = vrot.slane %v3355_v21, 1 }
  0x99   : > { %v3528_v62 = vsel %vm904_vm1, %v3317_v45, %v846_v57  ;;  %v872_v57 = vrot.slane %v3366_v31, 1  ;;  %v875_v21 = vrot.slane %v3377_v41, 1  ;;  %v877_v31 = vrot.slane %v3456_v40, 1 }
  0x9a   : > { %831 = vrot.lane.b32.xlu1 %v716_v34, %s3192_s27  ;;  %979 = vrot.lane.b32.xlu0 %v3504_v35, %s3192_s27  ;;  %v3584_v46 = vsel %vm849_vm2, %v862_v39, %v863_v37  ;;  %v883_v41 = vrot.slane %v3490_v15, 1  ;;  %v889_v7 = vrot.slane %v3253_v0, 1  ;;  %v890_v10 = vrot.slane %v3256_v1, 1 }
  0x9b   : > { %v822_v4 = vpop.permute.xlu1 %821  ;;  %v898_v0 = vrot.slane %v3317_v45, 1  ;;  %v899_v1 = vrot.slane %v3324_v52, 1  ;;  %v850_v45 = vrot.slane %v3440_v26, 1  ;;  %v851_v52 = vrot.slane %v3450_v32, 1  ;;  %v3148_v32 = vld [vmem:[%s4127_s3 + $0xc8] sm:$0xff]  }
  0x9c   : > { %v3539_v11 = vsel %vm904_vm1, %v3321_v49, %v822_v4  ;;  %v824_v13 = vpop.permute.xlu0 %823  ;;  %v866_v49 = vrot.slane %v3343_v9, 1  ;;  %v871_v9 = vrot.slane %v3358_v23, 1  ;;  %v878_v4 = vrot.slane %v3461_v47, 1 }
  0x9d   : > { %v3551_v6 = vsel %vm904_vm1, %v3335_v61, %v824_v13  ;;  %v895_v13 = vrot.slane %v3290_v27, 1  ;;  %v886_v27 = vrot.slane %v3431_v18, 1  ;;  %v852_v39 = vsel %vm849_vm2, %v850_v45, %v851_v52  ;;  %v3156_v52 = vld [vmem:[%s4127_s3 + $0xe8] sm:$0xff]  }
  0x9e   : > { %1031 = vrot.lane.b32.xlu1 %v3515_v48, %s3192_s27  ;;  %833 = vrot.lane.b32.xlu0 %v728_v50, %s3192_s27  ;;  %v865_v50 = vrot.slane %v3335_v61, 1  ;;  %v3604_v61 = vsel %vm849_vm2, %v868_v54, %v869_v56  ;;  %v3611_v59 = vsel %vm849_vm2, %v871_v9, %v872_v57  ;;  %v3149_v54 = vld [vmem:[%s4127_s3 + $0x88] sm:$0xff]  }
  0x9f   : > { %v826_v25 = vpop.permute.xlu1 %825  ;;  %v3655_v2 = vsel %vm849_vm2, %v895_v13, %v896_v24  ;;  %v3669_v30 = vsel %vm849_vm2, %v886_v27, %v887_v33  ;;  %v3165_v57 = vld [vmem:[%s4127_s3 + $0x108] sm:$0xff]   ;;  %v3154_v24 = vld [vmem:[%s4127_s3 + $0xe0] sm:$0xff]   ;;  %v3167_v27 = vld [vmem:[%s4127_s3 + $0x118] sm:$0xff]  }
  0xa0   : > { %v3564_v22 = vsel %vm904_vm1, %v3351_v20, %v826_v25  ;;  %v828_v34 = vpop.permute.xlu0 %827  ;;  %v3597_v51 = vsel %vm849_vm2, %v865_v50, %v866_v49  ;;  %v874_v20 = vrot.slane %v3372_v36, 1  ;;  %v3662_v25 = vsel %vm849_vm2, %v898_v0, %v899_v1  ;;  %v3155_v33 = vld [vmem:[%s4127_s3 + $0xa0] sm:$0xff]  }
  0xa1   : > { %v3577_v42 = vsel %vm904_vm1, %v3358_v23, %v828_v34 }
  0xa2   : > { %983 = vrot.lane.b32.xlu1 %v3524_v58, %s3192_s27  ;;  %1035 = vrot.lane.b32.xlu0 %v3528_v62, %s3192_s27  ;;  %v3621_v23 = vsel %vm849_vm2, %v874_v20, %v875_v21 }
  0xa4   : > { %v830_v44 = vpop.permute.xlu0 %829 }
  0xa5   : > { %v3590_v63 = vsel %vm904_vm1, %v3372_v36, %v830_v44  ;;  %v3629_v36 = vsel %vm849_vm2, %v877_v31, %v878_v4  ;;  %v892_v31 = vrot.slane %v3272_v12, 1  ;;  %v893_v4 = vrot.slane %v3275_v14, 1 }
  0xa6   : > { %835 = vrot.lane.b32.xlu1 %v740_v5, %s3192_s27  ;;  %987 = vrot.lane.b32.xlu0 %v3539_v11, %s3192_s27  ;;  %v884_v5 = vrot.slane %v3507_v43, 1  ;;  %v3648_v43 = vsel %vm849_vm2, %v889_v7, %v890_v10 }
  0xa7   : > { %v3734_v10 = vsel %vm849_vm2, %v892_v31, %v893_v4  ;;  %v3814_v4 = vld [vmem:[%s3636_s8 + $0x8] ss:$0 sps:$4 sm:$0x11]  }
  0xa8   : > { %v3641_v47 = vsel %vm849_vm2, %v883_v41, %v884_v5  ;;  %v3151_v41 = vld [vmem:[%s4127_s3 + $0x90] sm:$0xff]  }
  0xaa   : > { %977 = vrot.lane.b32.xlu1 %v3545_v17, %s3192_s27  ;;  %991 = vrot.lane.b32.xlu0 %v3551_v6, %s3192_s27 }
  0xae   : > { %981 = vrot.lane.b32.xlu1 %v3558_v29, %s3192_s27  ;;  %995 = vrot.lane.b32.xlu0 %v3564_v22, %s3192_s27 }
  0xb2   : > { %985 = vrot.lane.b32.xlu1 %v3571_v38, %s3192_s27  ;;  %999 = vrot.lane.b32.xlu0 %v3577_v42, %s3192_s27 }
  0xb6   : > { %989 = vrot.lane.b32.xlu1 %v3584_v46, %s3192_s27  ;;  %1003 = vrot.lane.b32.xlu0 %v3590_v63, %s3192_s27 }
  0xba   : > { %993 = vrot.lane.b32.xlu1 %v3597_v51, %s3192_s27 }
  0xbe   : > { %997 = vrot.lane.b32.xlu1 %v3604_v61, %s3192_s27 }
  0xc2   : > { %1001 = vrot.lane.b32.xlu1 %v3611_v59, %s3192_s27 }
  0xc6   : > { %1005 = vrot.lane.b32.xlu1 %v3621_v23, %s3192_s27 }
  0xca   : > { %1009 = vrot.lane.b32.xlu1 %v3629_v36, %s3192_s27 }
  0xce   : > { %1017 = vrot.lane.b32.xlu1 %v3641_v47, %s3192_s27 }
  0xd2   : > { %1025 = vrot.lane.b32.xlu1 %v3648_v43, %s3192_s27 }
  0xd6   : > { %1033 = vrot.lane.b32.xlu1 %v3655_v2, %s3192_s27 }
  0xda   : > { %1037 = vrot.lane.b32.xlu1 %v3662_v25, %s3192_s27 }
 0x100   : > { %v3673_v19 = vpop.permute.xlu1 %1023 }
 0x101   : > { %v1122_v34 = vsel %vm904_vm1, %v3669_v30, %v3673_v19 }
 0x102   : > { %1593 = vmatprep.mubr.bf16.mxu1 %v1122_v34 }
 0x104   : > { %v838_v37 = vpop.permute.xlu1 %837  ;;  %v3682_v44 = vpop.permute.xlu0 %975 }
 0x105   : > { %v3689_v50 = vsel %vm904_vm1, %v3431_v18, %v838_v37  ;;  %v1074_v49 = vsel %vm904_vm1, %v852_v39, %v3682_v44  ;;  %v3150_v18 = vld [vmem:[%s4127_s3 + $0xd0] sm:$0xff]  }
 0x106   : > { %1594 = vmatmul.mubr.bf16.vlgmr.msra.gmra.mrb[0].mxu1 %v3689_v50  ;;  %1497 = vmatprep.mubr.bf16.mxu0 %v1074_v49 }
 0x107   : > { %2881 = vmatpush3.bf16.msra.mxu1 %v3147_v28  ;;  %v3157_v28 = vld [vmem:[%s4127_s3 + $0xa8] sm:$0xff]  }
 0x108   : > { %v814_v56 = vpop.permute.xlu1 %813  ;;  %2882 = vmatprep.subr.bf16.mxu1 %v3148_v32  ;;  %v3697_v9 = vpop.permute.xlu0 %1027  ;;  %v3158_v32 = vld [vmem:[%s4127_s3 + $0xf0] sm:$0xff]  }
 0x109   : > { %v906_v20 = vsel %vm904_vm1, %v3440_v26, %v814_v56  ;;  %v1126_v21 = vsel %vm904_vm1, %v3648_v43, %v3697_v9  ;;  %v3152_v26 = vld [vmem:[%s4127_s3 + $0xd8] sm:$0xff]  }
 0x10a   : > { %1498 = vmatmul.mubr.bf16.vlgmr.msra.gmra.mrb[0].mxu0 %v906_v20  ;;  %1601 = vmatprep.mubr.bf16.mxu1 %v1126_v21  ;;  %v3798_v20 = vld [vmem:[%s3636_s8] sm:$0xff]   ;;  %v3160_v21 = vld [vmem:[%s4127_s3 + $0xf8] sm:$0xff]  }
 0x10b   : > { %2883 = vmatpush3.bf16.msra.mxu1 %v3149_v54  ;;  %3013 = vmatpush3.bf16.msra.mxu0 %v3162_v60  ;;  %v3166_v60 = vld [vmem:[%s4127_s3 + $0x110] sm:$0xff]  }
 0x10c   : > { %v832_v5 = vpop.permute.xlu1 %831  ;;  %2884 = vmatprep.subr.bf16.mxu1 %v3150_v18  ;;  %v3715_v7 = vpop.permute.xlu0 %979  ;;  %3014 = vmatprep.subr.bf16.mxu0 %v3165_v57  ;;  %v3159_v18 = vld [vmem:[%s4127_s3 + $0xb0] sm:$0xff]  }
 0x10d   : > { %v3722_v12 = vsel %vm904_vm1, %v3456_v40, %v832_v5  ;;  %v1078_v14 = vsel %vm904_vm1, %v3545_v17, %v3715_v7  ;;  %v3153_v40 = vld [vmem:[%s4127_s3 + $0x98] sm:$0xff]  }
 0x10e   : > { %1602 = vmatmul.mubr.bf16.gmra.mrb[4].mxu1 %v3469_v55  ;;  %1007 = vrot.lane.b32.xlu0 %v3722_v12, %s3192_s27 }
 0x10f   : > { %2885 = vmatpush3.bf16.msra.mxu1 %v3151_v41  ;;  %1505 = vmatprep.mubr.bf16.mxu0 %v1078_v14  ;;  %v804_v41 = vshll.u32 %v3798_v20, 16 }
 0x110   : > { %v3739_v13 = vpop.permute.xlu1 %1031  ;;  %2886 = vmatprep.subr.bf16.mxu1 %v3152_v26  ;;  %v834_v17 = vpop.permute.xlu0 %833  ;;  %3015 = vmatpush3.bf16.msra.mxu0 %v3165_v57  ;;  %v880_v57 = vrot.slane %v3465_v53, 1 }
 0x111   : > { %v1130_v0 = vsel %vm904_vm1, %v3734_v10, %v3739_v13  ;;  %v3749_v1 = vsel %vm904_vm1, %v3465_v53, %v834_v17  ;;  %3016 = vmatprep.subr.bf16.mxu0 %v3166_v60  ;;  %v806_v14 = vrot.slane %v804_v41, 1 }
 0x112   : > { %1506 = vmatmul.mubr.bf16.gmra.mrb[4].mxu0 %v3482_v8  ;;  %1609 = vmatprep.mubr.bf16.mxu1 %v1130_v0 }
 0x113   : > { %2887 = vmatpush3.bf16.msra.mxu1 %v3153_v40  ;;  %1011 = vrot.lane.b32.xlu0 %v3749_v1, %s3192_s27 }
 0x114   : > { %v3760_v45 = vpop.permute.xlu1 %983  ;;  %2888 = vmatprep.subr.bf16.mxu1 %v3154_v24  ;;  %v3765_v34 = vpop.permute.xlu0 %1035  ;;  %3017 = vmatpush3.bf16.msra.mxu0 %v3166_v60  ;;  %v809_v60 = vshll.u32 %v3814_v4, 16 }
 0x115   : > { %v1082_v8 = vsel %vm904_vm1, %v3558_v29, %v3760_v45  ;;  %v1134_v39 = vsel %vm904_vm1, %v3655_v2, %v3765_v34  ;;  %3018 = vmatprep.subr.bf16.mxu0 %v3167_v27 }
 0x116   : > { %1610 = vmatmul.mubr.bf16.gmra.mrb[8].mxu1 %v3494_v16  ;;  %1513 = vmatprep.mubr.bf16.mxu0 %v1082_v8  ;;  %v811_v0 = vrot.slane %v809_v60, 1 }
 0x117   : > { %2889 = vmatpush3.bf16.msra.mxu1 %v3155_v33  ;;  %1617 = vmatprep.mubr.bf16.mxu1 %v1134_v39 }
 0x118   : > { %v836_v37 = vpop.permute.xlu1 %835  ;;  %2890 = vmatprep.subr.bf16.mxu1 %v3156_v52  ;;  %v3780_v49 = vpop.permute.xlu0 %987  ;;  %3019 = vmatpush3.bf16.msra.mxu0 %v3167_v27 }
 0x119   : > { %v3784_v54 = vsel %vm904_vm1, %v3490_v15, %v836_v37  ;;  %v1086_v56 = vsel %vm904_vm1, %v3571_v38, %v3780_v49  ;;  %v881_v15 = vrot.slane %v3477_v3, 1  ;;  %v3161_v3 = vld [vmem:[%s4127_s3 + $0xb8] sm:$0xff]  }
 0x11a   : > { %1514 = vmatmul.mubr.bf16.gmra.mrb[8].mxu0 %v3504_v35  ;;  %1015 = vrot.lane.b32.xlu0 %v3784_v54, %s3192_s27 }
 0x11b   : > { %2891 = vmatpush3.bf16.msra.mxu1 %v3157_v28  ;;  %1521 = vmatprep.mubr.bf16.mxu0 %v1086_v56  ;;  %v3808_v53 = vsel %vm849_vm2, %v880_v57, %v881_v15 }
 0x11c   : > { %2892 = vmatprep.subr.bf16.mxu1 %v3158_v32  ;;  %v992_v31 = vpop.permute.xlu0 %991  ;;  %v978_v26 = vpop.permute.xlu1 %977 }
 0x11d   : > { %v1090_v5 = vsel %vm904_vm1, %v3584_v46, %v992_v31  ;;  %v1040_v40 = vsel %vm904_vm1, %v3682_v44, %v978_v26 }
 0x11e   : > { %1618 = vmatmul.mubr.bf16.gmra.mrb[12].mxu1 %v3515_v48  ;;  %1019 = vrot.lane.b32.xlu0 %v3689_v50, %s3192_s27 }
 0x11f   : > { %2893 = vmatpush3.bf16.msra.mxu1 %v3159_v18  ;;  %1658 = vmatprep.mubr.bf16.mxu1 %v3504_v35  ;;  %v802_v35 = vshrl.u32 %v3798_v20, 16 }
 0x120   : > { %2894 = vmatprep.subr.bf16.mxu1 %v3160_v21  ;;  %v996_v17 = vpop.permute.xlu0 %995  ;;  %v982_v33 = vpop.permute.xlu1 %981 }
 0x121   : > { %v807_v24 = vor.u32 %v806_v14, %v802_v35  ;;  %v1094_v27 = vsel %vm904_vm1, %v3597_v51, %v996_v17  ;;  %v1041_v52 = vsel %vm904_vm1, %v3715_v7, %v982_v33 }
 0x122   : > { %1522 = vmatmul.mubr.bf16.gmra.mrb[12].mxu0 %v3524_v58  ;;  %1013 = vrot.lane.b32.xlu0 %v3808_v53, %s3192_s27 }
 0x123   : > { %2895 = vmatpush3.bf16.msra.mxu1 %v3161_v3  ;;  %1529 = vmatprep.mubr.bf16.mxu0 %v1090_v5  ;;  %v812_v44 = vsel %vm596_vm0, %v807_v24, %v811_v0 }
 0x124   : > { %v1000_v8 = vpop.permute.xlu0 %999  ;;  %v986_v39 = vpop.permute.xlu1 %985 }
 0x125   : > { %v1042_v28 = vsel %vm904_vm1, %v3760_v45, %v986_v39 }
 0x126   : > { %1021 = vrot.lane.b32.xlu0 %v3669_v30, %s3192_s27  ;;  %1659 = vmatmul.mubr.bf16.vlgmr.msra.gmra.mrb[16].mxu1 %v1040_v40 }
 0x127   : > { %1666 = vmatprep.mubr.bf16.mxu1 %v3524_v58  ;;  %v1098_v58 = vsel %vm904_vm1, %v3604_v61, %v1000_v8 }
 0x128   : > { %v1004_v37 = vpop.permute.xlu0 %1003  ;;  %v990_v32 = vpop.permute.xlu1 %989 }
 0x129   : > { %v1102_v7 = vsel %vm904_vm1, %v3611_v59, %v1004_v37 }
 0x12a   : > { %1530 = vmatmul.mubr.bf16.gmra.mrb[16].mxu0 %v3539_v11  ;;  %1029 = vrot.lane.b32.xlu0 %v3734_v10, %s3192_s27 }
 0x12b   : > { %1537 = vmatprep.mubr.bf16.mxu0 %v1094_v27 }
 0x12c   : > { %v994_v56 = vpop.permute.xlu1 %993 }
 0x12d   : > { %v1044_v45 = vsel %vm904_vm1, %v992_v31, %v994_v56 }
 0x12e   : > { %1667 = vmatmul.mubr.bf16.gmra.mrb[20].mxu1 %v1041_v52  ;;  %847 = vrot.lane.b32.xlu0 %v812_v44, %s3192_s27 }
 0x12f   : > { %1674 = vmatprep.mubr.bf16.mxu1 %v3539_v11  ;;  %v1043_v11 = vsel %vm904_vm1, %v3780_v49, %v990_v32 }
 0x132   : > { %1538 = vmatmul.mubr.bf16.gmra.mrb[20].mxu0 %v3551_v6 }
 0x133   : > { %1545 = vmatprep.mubr.bf16.mxu0 %v1098_v58 }
 0x136   : > { %1675 = vmatmul.mubr.bf16.gmra.mrb[24].mxu1 %v1042_v28 }
 0x137   : > { %1682 = vmatprep.mubr.bf16.mxu1 %v3551_v6  ;;  %v998_v6 = vpop.permute.xlu1 %997 }
 0x138   : > { %v1045_v18 = vsel %vm904_vm1, %v996_v17, %v998_v6 }
 0x13a   : > { %1546 = vmatmul.mubr.bf16.gmra.mrb[24].mxu0 %v3564_v22 }
 0x13b   : > { %1553 = vmatprep.mubr.bf16.mxu0 %v1102_v7  ;;  %v1002_v57 = vpop.permute.xlu1 %1001 }
 0x13c   : > { %v1046_v49 = vsel %vm904_vm1, %v1000_v8, %v1002_v57 }
 0x13e   : > { %1683 = vmatmul.mubr.bf16.gmra.mrb[28].mxu1 %v1043_v11 }
 0x13f   : > { %1690 = vmatprep.mubr.bf16.mxu1 %v3564_v22  ;;  %v1006_v22 = vpop.permute.xlu1 %1005 }
 0x140   : > { %v1047_v15 = vsel %vm904_vm1, %v1004_v37, %v1006_v22 }
 0x142   : > { %1554 = vmatmul.mubr.bf16.gmra.mrb[28].mxu0 %v3577_v42 }
 0x143   : > { %v1010_v21 = vpop.permute.xlu1 %1009 }
 0x146   : > { %1691 = vmatmul.mubr.bf16.gmra.mrb[32].mxu1 %v1044_v45 }
 0x147   : > { %1698 = vmatprep.mubr.bf16.mxu1 %v3577_v42 }
 0x14e   : > { %1699 = vmatmul.mubr.bf16.gmra.mrb[36].mxu1 %v1045_v18 }
 0x14f   : > { %1706 = vmatprep.mubr.bf16.mxu1 %v3590_v63 }
 0x156   : > { %1707 = vmatmul.mubr.bf16.gmra.mrb[40].mxu1 %v1046_v49 }
 0x157   : > { %1714 = vmatprep.mubr.bf16.mxu1 %v3722_v12 }
 0x15e   : > { %1715 = vmatmul.mubr.bf16.gmra.mrb[44].mxu1 %v1047_v15 }
 0x15f   : > { %1722 = vmatprep.mubr.bf16.mxu1 %v3749_v1 }
 0x180   : > { %v1008_v42 = vpop.permute.xlu0 %1007 }
 0x181   : > { %v1106_v31 = vsel %vm904_vm1, %v3621_v23, %v1008_v42  ;;  %v1048_v3 = vsel %vm904_vm1, %v1008_v42, %v1010_v21 }
 0x182   : > { %1561 = vmatprep.mubr.bf16.mxu0 %v1106_v31  ;;  %1723 = vmatmul.mubr.bf16.gmra.mrb[48].mxu1 %v1048_v3 }
 0x183   : > { %1562 = vmatmul.mubr.bf16.gmra.mrb[32].mxu0 %v3590_v63  ;;  %1730 = vmatprep.mubr.bf16.mxu1 %v3784_v54 }
 0x185   : > { %v1012_v41 = vpop.permute.xlu0 %1011 }
 0x186   : > { %v1110_v5 = vsel %vm904_vm1, %v3629_v36, %v1012_v41 }
 0x187   : > { %1569 = vmatprep.mubr.bf16.mxu0 %v1110_v5 }
 0x18b   : > { %1570 = vmatmul.mubr.bf16.gmra.mrb[36].mxu0 %v3722_v12  ;;  %v1018_v12 = vpop.permute.xlu1 %1017 }
 0x18c   : > { %v1016_v26 = vpop.permute.xlu0 %1015 }
 0x18d   : > { %v1114_v35 = vsel %vm904_vm1, %v3808_v53, %v1016_v26  ;;  %v1050_v17 = vsel %vm904_vm1, %v1016_v26, %v1018_v12 }
 0x18e   : > { %1577 = vmatprep.mubr.bf16.mxu0 %v1114_v35 }
 0x190   : > { %v1020_v14 = vpop.permute.xlu0 %1019 }
 0x191   : > { %v1118_v63 = vsel %vm904_vm1, %v3641_v47, %v1020_v14 }
 0x193   : > { %1578 = vmatmul.mubr.bf16.gmra.mrb[40].mxu0 %v3749_v1 }
 0x194   : > { %1585 = vmatprep.mubr.bf16.mxu0 %v1118_v63  ;;  %v1014_v60 = vpop.permute.xlu0 %1013 }
 0x195   : > { %v1049_v40 = vsel %vm904_vm1, %v1012_v41, %v1014_v60 }
 0x196   : > { %1731 = vmatmul.mubr.bf16.gmra.mrb[52].mxu1 %v1049_v40 }
 0x197   : > { %1738 = vmatprep.mubr.bf16.mxu1 %v3689_v50 }
 0x198   : > { %v1022_v1 = vpop.permute.xlu0 %1021 }
 0x199   : > { %v1051_v50 = vsel %vm904_vm1, %v1020_v14, %v1022_v1  ;;  %v3945_v1 = vld [vmem:[%s4128_s4] ss:$0 sm:$0xff] }
 0x19b   : > { %1586 = vmatmul.mubr.bf16.gmra.mrb[44].mxu0 %v3784_v54  ;;  %v1026_v54 = vpop.permute.xlu1 %1025 }
 0x19c   : > { %3020 = vmatprep.mubr.msk.bf16.mxu0 %vm904_vm1, %v3558_v29  ;;  %v1030_v29 = vpop.permute.xlu0 %1029 }
 0x19e   : > { %1739 = vmatmul.mubr.bf16.gmra.mrb[56].mxu1 %v1050_v17 }
 0x19f   : > { %1746 = vmatprep.mubr.bf16.mxu1 %v3469_v55  ;;  %v1052_v55 = vsel %vm904_vm1, %v3673_v19, %v1026_v54 }
 0x1a3   : > { %3021 = vmatmul.mubr.msk.bf16.vlgmr.msra.gmra.mrb[48].mxu0 %vm904_vm1, %v3571_v38  ;;  %v848_v38 = vpop.permute.xlu0 %847 }
 0x1a4   : > { %3024 = vmatprep.mubr.msk.bf16.mxu0 %vm904_vm1, %v3584_v46  ;;  %v1034_v46 = vpop.permute.xlu1 %1033 }
 0x1a6   : > { %1747 = vmatmul.mubr.bf16.gmra.mrb[60].mxu1 %v1051_v50 }
 0x1a7   : > { %1754 = vmatprep.mubr.bf16.mxu1 %v3494_v16  ;;  %v1053_v16 = vsel %vm904_vm1, %v3697_v9, %v1030_v29 }
 0x1ab   : > { %3025 = vmatmul.mubr.msk.bf16.gmra.mrb[52].mxu0 %vm904_vm1, %v3597_v51  ;;  %v1054_v51 = vsel %vm904_vm1, %v3739_v13, %v1034_v46 }
 0x1ac   : > { %3028 = vmatprep.mubr.msk.bf16.mxu0 %vm904_vm1, %v3604_v61  ;;  %v1038_v61 = vpop.permute.xlu1 %1037 }
 0x1ae   : > { %1755 = vmatmul.mubr.bf16.gmra.mrb[64].mxu1 %v1052_v55 }
 0x1af   : > { %1762 = vmatprep.mubr.bf16.mxu1 %v3515_v48  ;;  %v957_v48 = vsel %vm904_vm1, %v3798_v20, %v848_v38 }
 0x1b3   : > { %3029 = vmatmul.mubr.msk.bf16.gmra.mrb[56].mxu0 %vm904_vm1, %v3611_v59  ;;  %v901_v59 = vrot.slane %v3798_v20, 1 }
 0x1b4   : > { %3032 = vmatprep.mubr.msk.bf16.mxu0 %vm904_vm1, %v3621_v23  ;;  %v902_v23 = vrot.slane %v3814_v4, 1 }
 0x1b6   : > { %1763 = vmatmul.mubr.bf16.gmra.mrb[68].mxu1 %v1053_v16 }
 0x1b7   : > { %1770 = vmatprep.mubr.bf16.mxu1 %v3528_v62  ;;  %v1055_v62 = vsel %vm904_vm1, %v3765_v34, %v1038_v61 }
 0x1bb   : > { %3033 = vmatmul.mubr.msk.bf16.gmra.mrb[60].mxu0 %vm904_vm1, %v3629_v36  ;;  %v903_v36 = vsel %vm849_vm2, %v901_v59, %v902_v23 }
 0x1bc   : > { %3036 = vmatprep.mubr.msk.bf16.mxu0 %vm904_vm1, %v3808_v53 }
 0x1be   : > { %1771 = vmatmul.mubr.bf16.gmra.mrb[72].mxu1 %v1054_v51 }
 0x1bf   : > { %1778 = vmatprep.mubr.bf16.mxu1 %v957_v48 }
 0x1c3   : > { %3037 = vmatmul.mubr.msk.bf16.gmra.mrb[64].mxu0 %vm904_vm1, %v3641_v47 }
 0x1c4   : > { %3040 = vmatprep.mubr.msk.bf16.mxu0 %vm904_vm1, %v3669_v30 }
 0x1c6   : > { %1779 = vmatmul.mubr.bf16.gmra.mrb[76].mxu1 %v1055_v62 }
 0x1cb   : > { %3041 = vmatmul.mubr.msk.bf16.gmra.mrb[68].mxu0 %vm904_vm1, %v3648_v43 }
 0x1cc   : > { %3044 = vmatprep.mubr.msk.bf16.mxu0 %vm904_vm1, %v3734_v10 }
 0x1d3   : > { %3045 = vmatmul.mubr.msk.bf16.gmra.mrb[72].mxu0 %vm904_vm1, %v3655_v2 }
 0x1d4   : > { %3048 = vmatprep.mubr.msk.bf16.mxu0 %vm904_vm1, %v3662_v25 }
 0x1d9   : > { %v2856_v47 = vpop.f32.mrb[0].mxu1 }
 0x1da   : > { %v2857_v30 = vpop.f32.mrb[1].mxu1 }
 0x1db   : > { %v3925_v19 = vadd.f32 %v2857_v30, %v2856_v47  ;;  %v2859_v43 = vpop.f32.mrb[2].mxu1  ;;  %3049 = vmatmul.mubr.msk.bf16.gmra.mrb[76].mxu0 %vm904_vm1, %v903_v36 }
 0x1dc   : > { %v2860_v9 = vpop.f32.mrb[3].mxu1 }
 0x1dd   : > { %v3928_v10 = vadd.f32 %v2860_v9, %v2859_v43  ;;  %v2784_v2 = vpop.f32.mrb[0].mxu0 }
 0x1de   : > { %v2785_v13 = vpop.f32.mrb[1].mxu0 }
 0x1df   : > { %v2786_v34 = vadd.f32 %v2785_v13, %v2784_v2  ;;  %v2787_v25 = vpop.f32.mrb[2].mxu0 }
 0x1e0   : > { %v2788_v53 = vpop.f32.mrb[3].mxu0 }
 0x1e1   : > { %v2789_v20 = vadd.f32 %v2788_v53, %v2787_v25  ;;  %v2862_v24 = vpop.f32.mrb[4].mxu1  ;;  %v1500_v54 = vadd.f32 %v2786_v34, %v3945_v1 }
 0x1e2   : > { %v2863_v4 = vpop.f32.mrb[5].mxu1 }
 0x1e3   : > { %v3930_v0 = vadd.f32 %v2863_v4, %v2862_v24  ;;  %v2865_v27 = vpop.f32.mrb[6].mxu1  ;;  %v1503_v38 = vadd.f32 %v2789_v20, %v3945_v1 }
 0x1e4   : > { %v2866_v33 = vpop.f32.mrb[7].mxu1 }
 0x1e5   : > { %v3932_v44 = vadd.f32 %v2866_v33, %v2865_v27  ;;  %v2790_v52 = vpop.f32.mrb[4].mxu0 }
 0x1e6   : > { %v2791_v8 = vpop.f32.mrb[5].mxu0 }
 0x1e7   : > { %v2792_v58 = vadd.f32 %v2791_v8, %v2790_v52  ;;  %v2793_v39 = vpop.f32.mrb[6].mxu0 }
 0x1e8   : > { %v2794_v28 = vpop.f32.mrb[7].mxu0 }
 0x1e9   : > { %v2795_v37 = vadd.f32 %v2794_v28, %v2793_v39  ;;  %v2868_v7 = vpop.f32.mrb[8].mxu1  ;;  %v1508_v9 = vadd.f32 %v2792_v58, %v3945_v1 }
 0x1ea   : > { %v2869_v32 = vpop.f32.mrb[9].mxu1 }
 0x1eb   : > { %v3934_v11 = vadd.f32 %v2869_v32, %v2868_v7  ;;  %v2871_v56 = vpop.f32.mrb[10].mxu1  ;;  %v1511_v25 = vadd.f32 %v2795_v37, %v3945_v1 }
 0x1ec   : > { %v2872_v45 = vpop.f32.mrb[11].mxu1 }
 0x1ed   : > { %v3936_v6 = vadd.f32 %v2872_v45, %v2871_v56  ;;  %v2796_v18 = vpop.f32.mrb[8].mxu0 }
 0x1ee   : > { %v2797_v57 = vpop.f32.mrb[9].mxu0 }
 0x1ef   : > { %v2798_v49 = vadd.f32 %v2797_v57, %v2796_v18  ;;  %v2799_v22 = vpop.f32.mrb[10].mxu0 }
 0x1f0   : > { %v2800_v15 = vpop.f32.mrb[11].mxu0 }
 0x1f1   : > { %v2801_v21 = vadd.f32 %v2800_v15, %v2799_v22  ;;  %v2874_v42 = vpop.f32.mrb[12].mxu1  ;;  %v1516_v58 = vadd.f32 %v2798_v49, %v3945_v1 }
 0x1f2   : > { %v2875_v31 = vpop.f32.mrb[13].mxu1 }
 0x1f3   : > { %v3938_v3 = vadd.f32 %v2875_v31, %v2874_v42  ;;  %v2877_v41 = vpop.f32.mrb[14].mxu1  ;;  %v1519_v37 = vadd.f32 %v2801_v21, %v3945_v1 }
 0x1f4   : > { %v2878_v5 = vpop.f32.mrb[15].mxu1 }
 0x1f5   : > { %v3940_v26 = vadd.f32 %v2878_v5, %v2877_v41  ;;  %v2802_v35 = vpop.f32.mrb[12].mxu0 }
 0x1f6   : > { %v2803_v14 = vpop.f32.mrb[13].mxu0 }
 0x1f7   : > { %v2804_v63 = vadd.f32 %v2803_v14, %v2802_v35  ;;  %v2805_v60 = vpop.f32.mrb[14].mxu0 }
 0x1f8   : > { %v2806_v40 = vpop.f32.mrb[15].mxu0 }
 0x1f9   : > { %v2807_v12 = vadd.f32 %v2806_v40, %v2805_v60  ;;  %v2896_v17 = vpop.f32.mrb[16].mxu1  ;;  %v1524_v49 = vadd.f32 %v2804_v63, %v3945_v1 }
 0x1fa   : > { %v2897_v50 = vpop.f32.mrb[17].mxu1 }
 0x1fb   : > { %v2898_v55 = vadd.f32 %v2897_v50, %v2896_v17  ;;  %v2899_v29 = vpop.f32.mrb[18].mxu1  ;;  %v1527_v21 = vadd.f32 %v2807_v12, %v3945_v1 }
 0x1fc   : > { %v2900_v16 = vpop.f32.mrb[19].mxu1 }
 0x1fd   : > { %v2901_v46 = vadd.f32 %v2900_v16, %v2899_v29  ;;  %v2808_v48 = vpop.f32.mrb[16].mxu0  ;;  %v3949_v51 = vadd.f32 %v2898_v55, %v1500_v54 }
 0x1fe   : > { %v2809_v61 = vpop.f32.mrb[17].mxu0 }
 0x1ff   : > { %v2810_v62 = vadd.f32 %v2809_v61, %v2808_v48  ;;  %v2811_v59 = vpop.f32.mrb[18].mxu0  ;;  %v3951_v23 = vadd.f32 %v2901_v46, %v1503_v38 }
 0x200   : > { %v2812_v36 = vpop.f32.mrb[19].mxu0 }
 0x201   : > { %v2813_v47 = vadd.f32 %v2812_v36, %v2811_v59  ;;  %v2902_v30 = vpop.f32.mrb[20].mxu1  ;;  %v1532_v63 = vadd.f32 %v2810_v62, %v3945_v1 }
 0x202   : > { %v2903_v43 = vpop.f32.mrb[21].mxu1 }
 0x203   : > { %v2904_v2 = vadd.f32 %v2903_v43, %v2902_v30  ;;  %v2905_v13 = vpop.f32.mrb[22].mxu1  ;;  %v1535_v12 = vadd.f32 %v2813_v47, %v3945_v1 }
 0x204   : > { %v2906_v34 = vpop.f32.mrb[23].mxu1 }
 0x205   : > { %v2907_v53 = vadd.f32 %v2906_v34, %v2905_v13  ;;  %v2814_v20 = vpop.f32.mrb[20].mxu0  ;;  %v3955_v24 = vadd.f32 %v2904_v2, %v1508_v9 }
 0x206   : > { %v2815_v4 = vpop.f32.mrb[21].mxu0 }
 0x207   : > { %v2816_v27 = vadd.f32 %v2815_v4, %v2814_v20  ;;  %v2817_v33 = vpop.f32.mrb[22].mxu0  ;;  %v3957_v52 = vadd.f32 %v2907_v53, %v1511_v25 }
 0x208   : > { %v2818_v8 = vpop.f32.mrb[23].mxu0 }
 0x209   : > { %v2819_v39 = vadd.f32 %v2818_v8, %v2817_v33  ;;  %v2908_v28 = vpop.f32.mrb[24].mxu1  ;;  %v1540_v4 = vadd.f32 %v2816_v27, %v3945_v1 }
 0x20a   : > { %v2909_v7 = vpop.f32.mrb[25].mxu1 }
 0x20b   : > { %v2910_v32 = vadd.f32 %v2909_v7, %v2908_v28  ;;  %v2911_v56 = vpop.f32.mrb[26].mxu1  ;;  %v1543_v7 = vadd.f32 %v2819_v39, %v3945_v1 }
 0x20c   : > { %v2912_v45 = vpop.f32.mrb[27].mxu1 }
 0x20d   : > { %v2913_v18 = vadd.f32 %v2912_v45, %v2911_v56  ;;  %v2820_v57 = vpop.f32.mrb[24].mxu0  ;;  %v3961_v22 = vadd.f32 %v2910_v32, %v1516_v58 }
 0x20e   : > { %v2821_v15 = vpop.f32.mrb[25].mxu0 }
 0x20f   : > { %v2822_v42 = vadd.f32 %v2821_v15, %v2820_v57  ;;  %v2823_v31 = vpop.f32.mrb[26].mxu0  ;;  %v3963_v41 = vadd.f32 %v2913_v18, %v1519_v37 }
 0x210   : > { %v2824_v5 = vpop.f32.mrb[27].mxu0 }
 0x211   : > { %v2825_v35 = vadd.f32 %v2824_v5, %v2823_v31  ;;  %v2914_v14 = vpop.f32.mrb[28].mxu1  ;;  %v1548_v45 = vadd.f32 %v2822_v42, %v3945_v1 }
 0x212   : > { %v2915_v60 = vpop.f32.mrb[29].mxu1 }
 0x213   : > { %v2916_v40 = vadd.f32 %v2915_v60, %v2914_v14  ;;  %v2917_v17 = vpop.f32.mrb[30].mxu1  ;;  %v1551_v15 = vadd.f32 %v2825_v35, %v3945_v1 }
 0x214   : > { %v2918_v50 = vpop.f32.mrb[31].mxu1 }
 0x215   : > { %v2919_v54 = vadd.f32 %v2918_v50, %v2917_v17  ;;  %v2826_v55 = vpop.f32.mrb[28].mxu0  ;;  %v3967_v29 = vadd.f32 %v2916_v40, %v1524_v49 }
 0x216   : > { %v2827_v16 = vpop.f32.mrb[29].mxu0 }
 0x217   : > { %v2828_v38 = vadd.f32 %v2827_v16, %v2826_v55  ;;  %v2829_v46 = vpop.f32.mrb[30].mxu0  ;;  %v3969_v48 = vadd.f32 %v2919_v54, %v1527_v21 }
 0x218   : > { %v2830_v61 = vpop.f32.mrb[31].mxu0 }
 0x219   : > { %v2831_v59 = vadd.f32 %v2830_v61, %v2829_v46  ;;  %v2920_v36 = vpop.f32.mrb[32].mxu1  ;;  %v1556_v60 = vadd.f32 %v2828_v38, %v3945_v1 }
 0x21a   : > { %v2921_v30 = vpop.f32.mrb[33].mxu1 }
 0x21b   : > { %v2922_v43 = vadd.f32 %v2921_v30, %v2920_v36  ;;  %v2923_v9 = vpop.f32.mrb[34].mxu1  ;;  %v1559_v50 = vadd.f32 %v2831_v59, %v3945_v1 }
 0x21c   : > { %v2924_v2 = vpop.f32.mrb[35].mxu1 }
 0x21d   : > { %v2925_v13 = vadd.f32 %v2924_v2, %v2923_v9  ;;  %v3973_v34 = vadd.f32 %v2922_v43, %v1532_v63 }
 0x21f   : > { %v3975_v25 = vadd.f32 %v2925_v13, %v1535_v12 }
 0x221   : > { %v2926_v53 = vpop.f32.mrb[36].mxu1 }
 0x222   : > { %v2927_v20 = vpop.f32.mrb[37].mxu1 }
 0x223   : > { %v2928_v33 = vadd.f32 %v2927_v20, %v2926_v53  ;;  %v2929_v8 = vpop.f32.mrb[38].mxu1 }
 0x224   : > { %v2930_v28 = vpop.f32.mrb[39].mxu1 }
 0x225   : > { %v2931_v62 = vadd.f32 %v2930_v28, %v2929_v8  ;;  %v3979_v58 = vadd.f32 %v2928_v33, %v1540_v4 }
 0x227   : > { %v3981_v32 = vadd.f32 %v2931_v62, %v1543_v7 }
 0x229   : > { %v2932_v47 = vpop.f32.mrb[40].mxu1 }
 0x22a   : > { %v2933_v56 = vpop.f32.mrb[41].mxu1 }
 0x22b   : > { %v2934_v37 = vadd.f32 %v2933_v56, %v2932_v47  ;;  %v2935_v18 = vpop.f32.mrb[42].mxu1 }
 0x22c   : > { %v2936_v57 = vpop.f32.mrb[43].mxu1 }
 0x22d   : > { %v2937_v27 = vadd.f32 %v2936_v57, %v2935_v18  ;;  %v3985_v31 = vadd.f32 %v2934_v37, %v1548_v45 }
 0x22f   : > { %v3987_v5 = vadd.f32 %v2937_v27, %v1551_v15 }
 0x231   : > { %v2938_v39 = vpop.f32.mrb[44].mxu1 }
 0x232   : > { %v2939_v14 = vpop.f32.mrb[45].mxu1 }
 0x233   : > { %v2940_v49 = vadd.f32 %v2939_v14, %v2938_v39  ;;  %v2941_v40 = vpop.f32.mrb[46].mxu1 }
 0x234   : > { %v2942_v17 = vpop.f32.mrb[47].mxu1 }
 0x235   : > { %v2943_v42 = vadd.f32 %v2942_v17, %v2941_v40  ;;  %v3991_v21 = vadd.f32 %v2940_v49, %v1556_v60 }
 0x237   : > { %v3993_v54 = vadd.f32 %v2943_v42, %v1559_v50 }
 0x255   : > { %v2944_v35 = vpop.f32.mrb[48].mxu1 }
 0x256   : > { %v2832_v55 = vpop.f32.mrb[32].mxu0  ;;  %v2945_v16 = vpop.f32.mrb[49].mxu1 }
 0x257   : > { %v2946_v46 = vadd.f32 %v2945_v16, %v2944_v35  ;;  %v2833_v61 = vpop.f32.mrb[33].mxu0  ;;  %v2947_v36 = vpop.f32.mrb[50].mxu1 }
 0x258   : > { %v2834_v30 = vadd.f32 %v2833_v61, %v2832_v55  ;;  %v2835_v63 = vpop.f32.mrb[34].mxu0  ;;  %v2948_v43 = vpop.f32.mrb[51].mxu1 }
 0x259   : > { %v2949_v38 = vadd.f32 %v2948_v43, %v2947_v36  ;;  %v2836_v9 = vpop.f32.mrb[35].mxu0 }
 0x25a   : > { %v1564_v2 = vadd.f32 %v2834_v30, %v3945_v1  ;;  %v2837_v12 = vadd.f32 %v2836_v9, %v2835_v63 }
 0x25c   : > { %v1567_v59 = vadd.f32 %v2837_v12, %v3945_v1  ;;  %v3997_v13 = vadd.f32 %v2946_v46, %v1564_v2 }
 0x25e   : > { %v2838_v53 = vpop.f32.mrb[36].mxu0  ;;  %v3999_v20 = vadd.f32 %v2949_v38, %v1567_v59 }
 0x25f   : > { %v2839_v4 = vpop.f32.mrb[37].mxu0 }
 0x260   : > { %v2840_v33 = vadd.f32 %v2839_v4, %v2838_v53  ;;  %v2841_v8 = vpop.f32.mrb[38].mxu0 }
 0x261   : > { %v2842_v28 = vpop.f32.mrb[39].mxu0 }
 0x262   : > { %v2843_v7 = vadd.f32 %v2842_v28, %v2841_v8  ;;  %v1572_v27 = vadd.f32 %v2840_v33, %v3945_v1 }
 0x264   : > { %v1575_v49 = vadd.f32 %v2843_v7, %v3945_v1 }
 0x266   : > { %v2844_v62 = vpop.f32.mrb[40].mxu0 }
 0x267   : > { %v2845_v47 = vpop.f32.mrb[41].mxu0 }
 0x268   : > { %v2846_v56 = vadd.f32 %v2845_v47, %v2844_v62  ;;  %v2847_v45 = vpop.f32.mrb[42].mxu0 }
 0x269   : > { %v2848_v37 = vpop.f32.mrb[43].mxu0  ;;  %v2950_v18 = vpop.f32.mrb[52].mxu1 }
 0x26a   : > { %v2849_v57 = vadd.f32 %v2848_v37, %v2847_v45  ;;  %v2951_v15 = vpop.f32.mrb[53].mxu1  ;;  %v1580_v63 = vadd.f32 %v2846_v56, %v3945_v1 }
 0x26b   : > { %v2952_v39 = vadd.f32 %v2951_v15, %v2950_v18  ;;  %v2953_v14 = vpop.f32.mrb[54].mxu1 }
 0x26c   : > { %v2954_v60 = vpop.f32.mrb[55].mxu1  ;;  %v1583_v2 = vadd.f32 %v2849_v57, %v3945_v1 }
 0x26d   : > { %v2955_v40 = vadd.f32 %v2954_v60, %v2953_v14  ;;  %v4003_v17 = vadd.f32 %v2952_v39, %v1572_v27 }
 0x26e   : > { %v2850_v50 = vpop.f32.mrb[44].mxu0 }
 0x26f   : > { %v2851_v42 = vpop.f32.mrb[45].mxu0  ;;  %v4005_v35 = vadd.f32 %v2955_v40, %v1575_v49 }
 0x270   : > { %v2852_v55 = vadd.f32 %v2851_v42, %v2850_v50  ;;  %v2853_v16 = vpop.f32.mrb[46].mxu0 }
 0x271   : > { %v2854_v46 = vpop.f32.mrb[47].mxu0  ;;  %v2956_v61 = vpop.f32.mrb[56].mxu1 }
 0x272   : > { %v2855_v36 = vadd.f32 %v2854_v46, %v2853_v16  ;;  %v2957_v30 = vpop.f32.mrb[57].mxu1  ;;  %v1588_v37 = vadd.f32 %v2852_v55, %v3945_v1 }
 0x273   : > { %v2958_v43 = vadd.f32 %v2957_v30, %v2956_v61  ;;  %v2959_v38 = vpop.f32.mrb[58].mxu1 }
 0x274   : > { %v2960_v9 = vpop.f32.mrb[59].mxu1 }
 0x275   : > { %v2961_v12 = vadd.f32 %v2960_v9, %v2959_v38  ;;  %v4009_v59 = vadd.f32 %v2958_v43, %v1580_v63 }
 0x276   : > { %v3022_v53 = vpop.f32.mrb[48].mxu0 }
 0x277   : > { %v1830_v4 = vadd.f32 %v3022_v53, %v3955_v24  ;;  %v1821_v33 = vpop.f32.mrb[49].mxu0  ;;  %v4012_v8 = vadd.f32 %v2961_v12, %v1583_v2  ;;  %v1596_v53 = vadd.f32 %v3925_v19, %v3945_v1 }
 0x278   : > { %v1822_v28 = vadd.f32 %v1821_v33, %v3949_v51  ;;  %v3023_v7 = vpop.f32.mrb[50].mxu0  ;;  %v1591_v51 = vadd.f32 %v2855_v36, %v3945_v1 }
 0x279   : > { %v1982_v62 = vmul.f32 0.01, %v1830_v4  ;;  %v1833_v47 = vadd.f32 %v3023_v7, %v3957_v52  ;;  %v2962_v56 = vpop.f32.mrb[60].mxu1  ;;  %v1824_v45 = vpop.f32.mrb[51].mxu0  ;;  %vm1950_vm3 = vcmp.ge.f32.partialorder %v1830_v4, 0.0 }
 0x27a   : > { %v1980_v18 = vmul.f32 0.01, %v1822_v28  ;;  %v1825_v57 = vadd.f32 %v1824_v45, %v3951_v23  ;;  %v2963_v15 = vpop.f32.mrb[61].mxu1  ;;  %vm1948_vm4 = vcmp.ge.f32.partialorder %v1822_v28, 0.0 }
 0x27b   : > { %vm1951_vm5 = vcmp.ge.f32.partialorder %v1833_v47, 0.0  ;;  %v1983_v24 = vmul.f32 0.01, %v1833_v47  ;;  %v2964_v27 = vadd.f32 %v2963_v15, %v2962_v56  ;;  %v2965_v39 = vpop.f32.mrb[62].mxu1  ;;  %v2014_v60 = vsel %vm1950_vm3, %v1830_v4, %v1982_v62 }
 0x27c   : > { %vm1949_vm6 = vcmp.ge.f32.partialorder %v1825_v57, 0.0  ;;  %v1981_v14 = vmul.f32 0.01, %v1825_v57  ;;  %v2966_v52 = vpop.f32.mrb[63].mxu1  ;;  %v2012_v50 = vsel %vm1948_vm4, %v1822_v28, %v1980_v18  ;;  %v1599_v62 = vadd.f32 %v3928_v10, %v3945_v1 }
 0x27d   : > { %v2015_v23 = vsel %vm1951_vm5, %v1833_v47, %v1983_v24  ;;  %v2967_v49 = vadd.f32 %v2966_v52, %v2965_v39  ;;  %v4025_v40 = vadd.f32 %v2964_v27, %v1588_v37 }
 0x27e   : > { %v2585_v42 = vpack.c.bf16 %v2015_v23, %v2014_v60  ;;  %v2013_v55 = vsel %vm1949_vm6, %v1825_v57, %v1981_v14  ;;  %v3026_v16 = vpop.f32.mrb[52].mxu0 }
 0x27f   : > { %v2580_v46 = vpack.c.bf16 %v2013_v55, %v2012_v50  ;;  %v1846_v61 = vadd.f32 %v3026_v16, %v3967_v29  ;;  %v1837_v36 = vpop.f32.mrb[53].mxu0  ;;  %v4028_v30 = vadd.f32 %v2967_v49, %v1591_v51  ;;  %v1604_v50 = vadd.f32 %v3930_v0, %v3945_v1 }
 0x280   : > { %2737 = vst [vmem:[%s4023_s9 + $0x10] sm:$0xff] %v2585_v42   ;;  %2753 = vst [vmem:[%s4023_s9 + $0x18] sm:$0xff] %v2585_v42   ;;  %v1838_v63 = vadd.f32 %v1837_v36, %v3961_v22  ;;  %v3027_v43 = vpop.f32.mrb[54].mxu0 }
 0x281   : > { %2581 = vst [vmem:[%s4023_s9] sm:$0xff] %v2580_v46   ;;  %2752 = vst [vmem:[%s4023_s9 + $0x8] sm:$0xff] %v2580_v46   ;;  %v1986_v38 = vmul.f32 0.01, %v1846_v61  ;;  %v1849_v9 = vadd.f32 %v3027_v43, %v3969_v48  ;;  %v2968_v2 = vpop.f32.mrb[64].mxu1  ;;  %v1840_v12 = vpop.f32.mrb[55].mxu0  ;;  %vm1954_vm7 = vcmp.ge.f32.partialorder %v1846_v61, 0.0 }
 0x282   : > { %v1984_v29 = vmul.f32 0.01, %v1838_v63  ;;  %v1841_v4 = vadd.f32 %v1840_v12, %v3963_v41  ;;  %v2969_v33 = vpop.f32.mrb[65].mxu1  ;;  %vm1952_vm8 = vcmp.ge.f32.partialorder %v1838_v63, 0.0 }
 0x283   : > { %vm1955_vm9 = vcmp.ge.f32.partialorder %v1849_v9, 0.0  ;;  %v1987_v28 = vmul.f32 0.01, %v1849_v9  ;;  %v2970_v22 = vadd.f32 %v2969_v33, %v2968_v2  ;;  %v2971_v7 = vpop.f32.mrb[66].mxu1  ;;  %v2018_v56 = vsel %vm1954_vm7, %v1846_v61, %v1986_v38 }
 0x284   : > { %vm1953_vm10 = vcmp.ge.f32.partialorder %v1841_v4, 0.0  ;;  %v1985_v48 = vmul.f32 0.01, %v1841_v4  ;;  %v2972_v47 = vpop.f32.mrb[67].mxu1  ;;  %v2016_v37 = vsel %vm1952_vm8, %v1838_v63, %v1984_v29  ;;  %v1607_v61 = vadd.f32 %v3932_v44, %v3945_v1 }
 0x285   : > { %v2019_v19 = vsel %vm1955_vm9, %v1849_v9, %v1987_v28  ;;  %v2973_v45 = vadd.f32 %v2972_v47, %v2971_v7  ;;  %v4041_v41 = vadd.f32 %v2970_v22, %v1596_v53  ;;  %v1612_v47 = vadd.f32 %v3934_v11, %v3945_v1 }
 0x286   : > { %v2595_v18 = vpack.c.bf16 %v2019_v19, %v2018_v56  ;;  %v2017_v57 = vsel %vm1953_vm10, %v1841_v4, %v1985_v48  ;;  %v3030_v15 = vpop.f32.mrb[56].mxu0 }
 0x287   : > { %v2590_v24 = vpack.c.bf16 %v2017_v57, %v2016_v37  ;;  %v1862_v27 = vadd.f32 %v3030_v15, %v3979_v58  ;;  %v1853_v10 = vpop.f32.mrb[57].mxu0  ;;  %v4044_v39 = vadd.f32 %v2973_v45, %v1599_v62 }
 0x288   : > { %2739 = vst [vmem:[%s4023_s9 + $0x30] sm:$0xff] %v2595_v18   ;;  %2755 = vst [vmem:[%s4023_s9 + $0x38] sm:$0xff] %v2595_v18   ;;  %v1854_v51 = vadd.f32 %v1853_v10, %v3973_v34  ;;  %v3031_v14 = vpop.f32.mrb[58].mxu0  ;;  %v1615_v18 = vadd.f32 %v3936_v6, %v3945_v1 }
 0x289   : > { %2738 = vst [vmem:[%s4023_s9 + $0x20] sm:$0xff] %v2590_v24   ;;  %2754 = vst [vmem:[%s4023_s9 + $0x28] sm:$0xff] %v2590_v24   ;;  %v1990_v52 = vmul.f32 0.01, %v1862_v27  ;;  %v1865_v60 = vadd.f32 %v3031_v14, %v3981_v32  ;;  %v2974_v23 = vpop.f32.mrb[68].mxu1  ;;  %v1856_v49 = vpop.f32.mrb[59].mxu0 }
 0x28a   : > { %vm1958_vm11 = vcmp.ge.f32.partialorder %v1862_v27, 0.0  ;;  %v1988_v58 = vmul.f32 0.01, %v1854_v51  ;;  %v1857_v42 = vadd.f32 %v1856_v49, %v3975_v25  ;;  %v2975_v55 = vpop.f32.mrb[69].mxu1  ;;  %vm1956_vm12 = vcmp.ge.f32.partialorder %v1854_v51, 0.0 }
 0x28b   : > { %vm1959_vm13 = vcmp.ge.f32.partialorder %v1865_v60, 0.0  ;;  %v1991_v16 = vmul.f32 0.01, %v1865_v60  ;;  %v2976_v34 = vadd.f32 %v2975_v55, %v2974_v23  ;;  %v2977_v46 = vpop.f32.mrb[70].mxu1  ;;  %v2022_v63 = vsel %vm1958_vm11, %v1862_v27, %v1990_v52 }
 0x28c   : > { %vm1957_vm14 = vcmp.ge.f32.partialorder %v1857_v42, 0.0  ;;  %v1989_v32 = vmul.f32 0.01, %v1857_v42  ;;  %v2978_v36 = vpop.f32.mrb[71].mxu1  ;;  %v2020_v38 = vsel %vm1956_vm12, %v1854_v51, %v1988_v58 }
 0x28d   : > { %v2023_v0 = vsel %vm1959_vm13, %v1865_v60, %v1991_v16  ;;  %v2979_v43 = vadd.f32 %v2978_v36, %v2977_v46  ;;  %v4057_v25 = vadd.f32 %v2976_v34, %v1604_v50  ;;  %v1620_v34 = vadd.f32 %v3938_v3, %v3945_v1 }
 0x28e   : > { %v2605_v9 = vpack.c.bf16 %v2023_v0, %v2022_v63  ;;  %v2021_v2 = vsel %vm1957_vm14, %v1857_v42, %v1989_v32  ;;  %v3034_v12 = vpop.f32.mrb[60].mxu0  ;;  %v1623_v63 = vadd.f32 %v3940_v26, %v3945_v1 }
 0x28f   : > { %v2600_v53 = vpack.c.bf16 %v2021_v2, %v2020_v38  ;;  %v1878_v29 = vadd.f32 %v3034_v12, %v3991_v21  ;;  %v1869_v44 = vpop.f32.mrb[61].mxu0  ;;  %v4060_v4 = vadd.f32 %v2979_v43, %v1607_v61 }
 0x290   : > { %2741 = vst [vmem:[%s4023_s9 + $0x50] sm:$0xff] %v2605_v9   ;;  %2757 = vst [vmem:[%s4023_s9 + $0x58] sm:$0xff] %v2605_v9   ;;  %v1870_v33 = vadd.f32 %v1869_v44, %v3985_v31  ;;  %v3035_v28 = vpop.f32.mrb[62].mxu0 }
 0x291   : > { %2740 = vst [vmem:[%s4023_s9 + $0x40] sm:$0xff] %v2600_v53   ;;  %2756 = vst [vmem:[%s4023_s9 + $0x48] sm:$0xff] %v2600_v53   ;;  %v1994_v22 = vmul.f32 0.01, %v1878_v29  ;;  %v1881_v7 = vadd.f32 %v3035_v28, %v3993_v54  ;;  %v2980_v62 = vpop.f32.mrb[72].mxu1  ;;  %v1872_v48 = vpop.f32.mrb[63].mxu0 }
 0x292   : > { %vm1962_vm15 = vcmp.ge.f32.partialorder %v1878_v29, 0.0  ;;  %v1992_v21 = vmul.f32 0.01, %v1870_v33  ;;  %v1873_v56 = vadd.f32 %v1872_v48, %v3987_v5  ;;  %v2981_v19 = vpop.f32.mrb[73].mxu1  ;;  %vm1960_vm0 = vcmp.ge.f32.partialorder %v1870_v33, 0.0 }
 0x293   : > { %vm1963_vm1 = vcmp.ge.f32.partialorder %v1881_v7, 0.0  ;;  %v1995_v45 = vmul.f32 0.01, %v1881_v7  ;;  %v2982_v31 = vadd.f32 %v2981_v19, %v2980_v62  ;;  %v2983_v37 = vpop.f32.mrb[74].mxu1  ;;  %v2026_v15 = vsel %vm1962_vm15, %v1878_v29, %v1994_v22 }
 0x294   : > { %vm1961_vm2 = vcmp.ge.f32.partialorder %v1873_v56, 0.0  ;;  %v1993_v54 = vmul.f32 0.01, %v1873_v56  ;;  %v2984_v57 = vpop.f32.mrb[75].mxu1  ;;  %v2024_v27 = vsel %vm1960_vm0, %v1870_v33, %v1992_v21 }
 0x295   : > { %v2027_v11 = vsel %vm1963_vm1, %v1881_v7, %v1995_v45  ;;  %v2985_v24 = vadd.f32 %v2984_v57, %v2983_v37  ;;  %v4073_v5 = vadd.f32 %v2982_v31, %v1612_v47 }
 0x296   : > { %v2615_v10 = vpack.c.bf16 %v2027_v11, %v2026_v15  ;;  %v2025_v51 = vsel %vm1961_vm2, %v1873_v56, %v1993_v54  ;;  %v3038_v14 = vpop.f32.mrb[64].mxu0 }
 0x297   : > { %v2610_v52 = vpack.c.bf16 %v2025_v51, %v2024_v27  ;;  %v1894_v60 = vadd.f32 %v3038_v14, %v4003_v17  ;;  %v1885_v6 = vpop.f32.mrb[65].mxu0  ;;  %v4076_v23 = vadd.f32 %v2985_v24, %v1615_v18 }
 0x298   : > { %2743 = vst [vmem:[%s4023_s9 + $0x70] sm:$0xff] %v2615_v10   ;;  %2759 = vst [vmem:[%s4023_s9 + $0x78] sm:$0xff] %v2615_v10   ;;  %v1886_v49 = vadd.f32 %v1885_v6, %v3997_v13  ;;  %v3039_v50 = vpop.f32.mrb[66].mxu0 }
 0x299   : > { %2742 = vst [vmem:[%s4023_s9 + $0x60] sm:$0xff] %v2610_v52   ;;  %2758 = vst [vmem:[%s4023_s9 + $0x68] sm:$0xff] %v2610_v52   ;;  %v1998_v58 = vmul.f32 0.01, %v1894_v60  ;;  %v1897_v42 = vadd.f32 %v3039_v50, %v4005_v35  ;;  %v2986_v55 = vpop.f32.mrb[76].mxu1  ;;  %v1888_v16 = vpop.f32.mrb[67].mxu0 }
 0x29a   : > { %vm1966_vm3 = vcmp.ge.f32.partialorder %v1894_v60, 0.0  ;;  %v1996_v17 = vmul.f32 0.01, %v1886_v49  ;;  %v1889_v46 = vadd.f32 %v1888_v16, %v3999_v20  ;;  %v2987_v61 = vpop.f32.mrb[77].mxu1  ;;  %vm1964_vm4 = vcmp.ge.f32.partialorder %v1886_v49, 0.0 }
 0x29b   : > { %vm1967_vm5 = vcmp.ge.f32.partialorder %v1897_v42, 0.0  ;;  %v1999_v32 = vmul.f32 0.01, %v1897_v42  ;;  %v2988_v13 = vadd.f32 %v2987_v61, %v2986_v55  ;;  %v2989_v36 = vpop.f32.mrb[78].mxu1  ;;  %v2030_v43 = vsel %vm1966_vm3, %v1894_v60, %v1998_v58 }
 0x29c   : > { %vm1965_vm6 = vcmp.ge.f32.partialorder %v1889_v46, 0.0  ;;  %v1997_v35 = vmul.f32 0.01, %v1889_v46  ;;  %v2990_v0 = vpop.f32.mrb[79].mxu1  ;;  %v2028_v9 = vsel %vm1964_vm4, %v1886_v49, %v1996_v17 }
 0x29d   : > { %v2031_v3 = vsel %vm1967_vm5, %v1897_v42, %v1999_v32  ;;  %v2991_v38 = vadd.f32 %v2990_v0, %v2989_v36  ;;  %v1781_v20 = vadd.f32 %v2988_v13, %v1620_v34 }
 0x29e   : > { %v2625_v2 = vpack.c.bf16 %v2031_v3, %v2030_v43  ;;  %v2029_v12 = vsel %vm1965_vm6, %v1889_v46, %v1997_v35  ;;  %v3042_v53 = vpop.f32.mrb[68].mxu0 }
 0x29f   : > { %v2620_v29 = vpack.c.bf16 %v2029_v12, %v2028_v9  ;;  %v1910_v44 = vadd.f32 %v3042_v53, %v4025_v40  ;;  %v1901_v33 = vpop.f32.mrb[69].mxu0  ;;  %v1784_v26 = vadd.f32 %v2991_v38, %v1623_v63 }
 0x2a0   : > { %2745 = vst [vmem:[%s4023_s9 + $0x90] sm:$0xff] %v2625_v2   ;;  %2761 = vst [vmem:[%s4023_s9 + $0x98] sm:$0xff] %v2625_v2   ;;  %v1902_v1 = vadd.f32 %v1901_v33, %v4009_v59  ;;  %v3043_v28 = vpop.f32.mrb[70].mxu0 }
 0x2a1   : > { %2744 = vst [vmem:[%s4023_s9 + $0x80] sm:$0xff] %v2620_v29   ;;  %2760 = vst [vmem:[%s4023_s9 + $0x88] sm:$0xff] %v2620_v29   ;;  %v2002_v22 = vmul.f32 0.01, %v1910_v44  ;;  %v1913_v7 = vadd.f32 %v3043_v28, %v4028_v30  ;;  %v1904_v62 = vpop.f32.mrb[71].mxu0  ;;  %vm1970_vm7 = vcmp.ge.f32.partialorder %v1910_v44, 0.0 }
 0x2a2   : > { %v2000_v48 = vmul.f32 0.01, %v1902_v1  ;;  %v1905_v47 = vadd.f32 %v1904_v62, %v4012_v8  ;;  %vm1968_vm8 = vcmp.ge.f32.partialorder %v1902_v1, 0.0 }
 0x2a3   : > { %vm1971_vm9 = vcmp.ge.f32.partialorder %v1913_v7, 0.0  ;;  %v2003_v40 = vmul.f32 0.01, %v1913_v7  ;;  %v2034_v21 = vsel %vm1970_vm7, %v1910_v44, %v2002_v22 }
 0x2a4   : > { %vm1969_vm10 = vcmp.ge.f32.partialorder %v1905_v47, 0.0  ;;  %v2001_v59 = vmul.f32 0.01, %v1905_v47  ;;  %v2032_v19 = vsel %vm1968_vm8, %v1902_v1, %v2000_v48 }
 0x2a5   : > { %v2035_v56 = vsel %vm1971_vm9, %v1913_v7, %v2003_v40 }
 0x2a6   : > { %v2635_v45 = vpack.c.bf16 %v2035_v56, %v2034_v21  ;;  %v2033_v31 = vsel %vm1969_vm10, %v1905_v47, %v2001_v59  ;;  %v3046_v30 = vpop.f32.mrb[72].mxu0 }
 0x2a7   : > { %v2630_v37 = vpack.c.bf16 %v2033_v31, %v2032_v19  ;;  %v1926_v18 = vadd.f32 %v3046_v30, %v4057_v25  ;;  %v1917_v54 = vpop.f32.mrb[73].mxu0 }
 0x2a8   : > { %2747 = vst [vmem:[%s4023_s9 + $0xb0] sm:$0xff] %v2635_v45   ;;  %2763 = vst [vmem:[%s4023_s9 + $0xb8] sm:$0xff] %v2635_v45   ;;  %v1918_v8 = vadd.f32 %v1917_v54, %v4041_v41  ;;  %v3047_v57 = vpop.f32.mrb[74].mxu0 }
 0x2a9   : > { %2746 = vst [vmem:[%s4023_s9 + $0xa0] sm:$0xff] %v2630_v37   ;;  %2762 = vst [vmem:[%s4023_s9 + $0xa8] sm:$0xff] %v2630_v37   ;;  %v2006_v15 = vmul.f32 0.01, %v1926_v18  ;;  %v1929_v11 = vadd.f32 %v3047_v57, %v4060_v4  ;;  %v1920_v24 = vpop.f32.mrb[75].mxu0  ;;  %vm1974_vm11 = vcmp.ge.f32.partialorder %v1926_v18, 0.0 }
 0x2aa   : > { %v2004_v27 = vmul.f32 0.01, %v1918_v8  ;;  %v1921_v10 = vadd.f32 %v1920_v24, %v4044_v39  ;;  %vm1972_vm12 = vcmp.ge.f32.partialorder %v1918_v8, 0.0 }
 0x2ab   : > { %vm1975_vm13 = vcmp.ge.f32.partialorder %v1929_v11, 0.0  ;;  %v2007_v25 = vmul.f32 0.01, %v1929_v11  ;;  %v2038_v51 = vsel %vm1974_vm11, %v1926_v18, %v2006_v15 }
 0x2ac   : > { %vm1973_vm14 = vcmp.ge.f32.partialorder %v1921_v10, 0.0  ;;  %v2005_v41 = vmul.f32 0.01, %v1921_v10  ;;  %v2036_v52 = vsel %vm1972_vm12, %v1918_v8, %v2004_v27 }
 0x2ad   : > { %v2039_v14 = vsel %vm1975_vm13, %v1929_v11, %v2007_v25 }
 0x2ae   : > { %v2645_v60 = vpack.c.bf16 %v2039_v14, %v2038_v51  ;;  %v2037_v6 = vsel %vm1973_vm14, %v1921_v10, %v2005_v41  ;;  %v3050_v4 = vpop.f32.mrb[76].mxu0 }
 0x2af   : > { %v2640_v49 = vpack.c.bf16 %v2037_v6, %v2036_v52  ;;  %v1942_v50 = vadd.f32 %v3050_v4, %v1781_v20  ;;  %v1933_v58 = vpop.f32.mrb[77].mxu0 }
 0x2b0   : > { %2749 = vst [vmem:[%s4023_s9 + $0xd0] sm:$0xff] %v2645_v60   ;;  %2765 = vst [vmem:[%s4023_s9 + $0xd8] sm:$0xff] %v2645_v60   ;;  %v1934_v39 = vadd.f32 %v1933_v58, %v4073_v5  ;;  %v3051_v42 = vpop.f32.mrb[78].mxu0 }
 0x2b1   : > { %2748 = vst [vmem:[%s4023_s9 + $0xc0] sm:$0xff] %v2640_v49   ;;  %2764 = vst [vmem:[%s4023_s9 + $0xc8] sm:$0xff] %v2640_v49   ;;  %v2010_v55 = vmul.f32 0.01, %v1942_v50  ;;  %v1945_v16 = vadd.f32 %v3051_v42, %v1784_v26  ;;  %v1936_v34 = vpop.f32.mrb[79].mxu0  ;;  %vm1978_vm15 = vcmp.ge.f32.partialorder %v1942_v50, 0.0 }
 0x2b2   : > { %v2008_v17 = vmul.f32 0.01, %v1934_v39  ;;  %v1937_v46 = vadd.f32 %v1936_v34, %v4076_v23  ;;  %vm1976_vm0 = vcmp.ge.f32.partialorder %v1934_v39, 0.0 }
 0x2b3   : > { %vm1979_vm1 = vcmp.ge.f32.partialorder %v1945_v16, 0.0  ;;  %v2011_v61 = vmul.f32 0.01, %v1945_v16  ;;  %v2042_v5 = vsel %vm1978_vm15, %v1942_v50, %v2010_v55 }
 0x2b4   : > { %vm1977_vm2 = vcmp.ge.f32.partialorder %v1937_v46, 0.0  ;;  %v2009_v32 = vmul.f32 0.01, %v1937_v46  ;;  %v2040_v36 = vsel %vm1976_vm0, %v1934_v39, %v2008_v17 }
 0x2b5   : > { %v2043_v13 = vsel %vm1979_vm1, %v1945_v16, %v2011_v61 }
 0x2b6   : > { %v2655_v63 = vpack.c.bf16 %v2043_v13, %v2042_v5  ;;  %v2041_v35 = vsel %vm1977_vm2, %v1937_v46, %v2009_v32 }
 0x2b7   : > { %v2650_v0 = vpack.c.bf16 %v2041_v35, %v2040_v36 }
 0x2b8   : > { %2751 = vst [vmem:[%s4023_s9 + $0xf0] sm:$0xff] %v2655_v63   ;;  %2767 = vst [vmem:[%s4023_s9 + $0xf8] sm:$0xff] %v2655_v63  }
 0x2b9   : > { %2750 = vst [vmem:[%s4023_s9 + $0xe0] sm:$0xff] %v2650_v0   ;;  %2766 = vst [vmem:[%s4023_s9 + $0xe8] sm:$0xff] %v2650_v0  }
 0x2ba PF: > { %s15_s20 = sadd.s32 1, %s3190_s20   ;;  %s4130_s18 = smov %s3186_s19 }
 0x2bb   : > { %p12_p5 = scmp.ge.s32.totalorder %s15_s20, 4   ;;  %s4131_s19 = smov %s4133_s21 }
 0x2bd   :  { %14 = sbr.rel (!%p12_p5) target bundleno = 2 (0x2), region = 77 }

</bundles_post_ra>
